<compile_context>
chip_gen: v6e
topology: v6e:2x2x1
jax: 0.10.0
libtpu: 0.0.40
codegen_flags: <defaults>
</compile_context>

<pallas_src>
import functools

import jax
import jax.numpy as jnp
from jax.experimental import pallas as pl
from jax.experimental.pallas import tpu as pltpu


def _round_up(n: int, m: int) -> int:
    return ((n + m - 1) // m) * m


def _vmem_capacity_bytes() -> int:
    """Physical VMEM capacity of the local TPU; conservative fallback."""
    try:
        return int(pltpu.get_tpu_info().vmem_capacity_bytes)
    except Exception:
        return 64 << 20          # v7x-class (smallest) assumption


def _vmem_need(TB, TH, D_pad, cbytes, obytes, weight_bufs, use_scratch):
    need = (
        2 * TB * D_pad * cbytes            # x tile (double-buffered)
        + weight_bufs * D_pad * TH * cbytes  # encoder weight tile
        + 2 * 8 * TH * 4                   # bias tile (sublane-padded f32)
        + weight_bufs * TH * D_pad * cbytes  # decoder weight tile
        + 2 * TB * TH * obytes             # features output tile
        + 2 * TB * D_pad * obytes          # reconstruction output tile
    )
    if use_scratch:
        need += TB * D_pad * 4             # f32 accumulator scratch
    return need


def _prepare(arr, shape, dtype):
    """Cast (no-op if already `dtype`) and zero-pad only when shape differs."""
    arr = arr.astype(dtype)
    if arr.shape == tuple(shape):
        return arr
    out = jnp.zeros(shape, dtype)
    return out.at[tuple(slice(0, s) for s in arr.shape)].set(arr)


def _sae_kernel_scratch(x_ref, w_enc_ref, b_enc_ref, w_dec_ref,
                        feat_ref, rec_ref, acc_ref):
    """Grid = (batch_tiles, hidden_tiles); hidden axis is the decoder reduction.

    Used when the output dtype != float32: accumulate in a f32 VMEM scratch.
    """
    h = pl.program_id(1)

    # Encoder: (TB, D) @ (D, TH) -> f32 (TB, TH) on the MXU.
    pre = jnp.dot(x_ref[...], w_enc_ref[...],
                  preferred_element_type=jnp.float32)
    # Bias add + ReLU in f32 (v5e has no bf16 VPU path).
    feats_f32 = jnp.maximum(pre + b_enc_ref[...], 0.0)
    # Single cast to the decoder compute dtype, reused for store + matmul.
    feats_lo = feats_f32.astype(w_dec_ref.dtype)
    if feat_ref.dtype == w_dec_ref.dtype:
        feat_ref[...] = feats_lo
    else:
        feat_ref[...] = feats_f32.astype(feat_ref.dtype)

    # Decoder partial product: (TB, TH) @ (TH, D), f32 accumulation.
    partial = jnp.dot(feats_lo, w_dec_ref[...],
                      preferred_element_type=jnp.float32)

    @pl.when(h == 0)
    def _():
        acc_ref[...] = partial

    @pl.when(h > 0)
    def _():
        acc_ref[...] += partial

    @pl.when(h == pl.num_programs(1) - 1)
    def _():
        rec_ref[...] = acc_ref[...].astype(rec_ref.dtype)


def _sae_kernel_direct(x_ref, w_enc_ref, b_enc_ref, w_dec_ref,
                       feat_ref, rec_ref):
    """Same as above but out dtype == float32: accumulate directly into the
    VMEM-resident reconstruction block (no scratch, no final copy)."""
    h = pl.program_id(1)

    pre = jnp.dot(x_ref[...], w_enc_ref[...],
                  preferred_element_type=jnp.float32)
    feats_f32 = jnp.maximum(pre + b_enc_ref[...], 0.0)
    feats_lo = feats_f32.astype(w_dec_ref.dtype)
    if feat_ref.dtype == w_dec_ref.dtype:
        feat_ref[...] = feats_lo
    else:
        feat_ref[...] = feats_f32.astype(feat_ref.dtype)

    partial = jnp.dot(feats_lo, w_dec_ref[...],
                      preferred_element_type=jnp.float32)

    @pl.when(h == 0)
    def _():
        rec_ref[...] = partial

    @pl.when(h > 0)
    def _():
        rec_ref[...] += partial


def sparse_autoencoder_forward(x, w_enc, b_enc, w_dec, *,
                               batch_tile=None, hidden_tile=None,
                               weight_buffers=None,
                               compute_dtype=jnp.bfloat16):
    """x: (B, D_in); w_enc: (D_in, H); b_enc: (H,); w_dec: (H, D_in).

    Returns (features (B, H), reconstruction (B, D_in)) in x.dtype.
    Pass weights pre-cast to `compute_dtype` to make the prepare step a no-op.
    """
    B, D_in = x.shape
    D2, H = w_enc.shape
    assert D2 == D_in and b_enc.shape == (H,) and w_dec.shape == (H, D_in)
    out_dtype = x.dtype
    use_scratch = jnp.dtype(out_dtype) != jnp.dtype(jnp.float32)

    cbytes = jnp.dtype(compute_dtype).itemsize
    obytes = jnp.dtype(out_dtype).itemsize

    # ---- Generation-aware VMEM budget and tile targets ---------------------
    vmem_cap = _vmem_capacity_bytes()
    budget = int(vmem_cap * 0.85)          # leave headroom for compiler scratch
    big_vmem = vmem_cap >= (100 << 20)     # v5e/v6e (128 MiB) vs v7x (64 MiB)

    if batch_tile is None:
        batch_tile = 512                   # arithmetic-intensity lever
    if hidden_tile is None:
        hidden_tile = 1024 if big_vmem else 512

    # Tile sizes respecting the (8, 128) layout constraint; never exceed the
    # (rounded) problem size so padded-batch waste stays minimal.
    TB = _round_up(min(batch_tile, _round_up(B, 8)), 8)
    TH = _round_up(min(hidden_tile, _round_up(H, 128)), 128)
    D_pad = _round_up(D_in, 128)           # lane-dense contraction / output

    # Shrink to fit the VMEM budget: TH first (accumulator RMW trade), TB last
    # (TB is the HBM-traffic lever, keep it as large as possible).
    while _vmem_need(TB, TH, D_pad, cbytes, obytes, 2, use_scratch) > budget:
        if TH > 128:
            TH = _round_up(TH // 2, 128)
        elif TB > 8:
            TB = _round_up(TB // 2, 8)
        else:
            break

    # Deeper weight buffering only where plenty of VMEM headroom remains.
    if weight_buffers is None:
        wb = 3 if (big_vmem and
                   _vmem_need(TB, TH, D_pad, cbytes, obytes, 3, use_scratch)
                   <= int(budget * 0.9)) else 2
    else:
        wb = int(weight_buffers)

    B_pad = _round_up(B, TB)
    H_pad = _round_up(H, TH)
    grid = (B_pad // TB, H_pad // TH)

    # ---- Operand prep: cast, pad only when shapes are not tile-aligned -----
    xc = _prepare(x, (B_pad, D_pad), compute_dtype)
    wec = _prepare(w_enc, (D_pad, H_pad), compute_dtype)
    bec = _prepare(b_enc.reshape(1, H), (1, H_pad), jnp.float32)
    wdc = _prepare(w_dec, (H_pad, D_pad), compute_dtype)

    need = _vmem_need(TB, TH, D_pad, cbytes, obytes, wb, use_scratch)
    vmem_limit = min(max(budget, int(need * 1.2) + (1 << 20)),
                     vmem_cap - (2 << 20))

    # Weights are re-streamed from HBM once per batch tile.
    n_batch_tiles = grid[0]
    cost = pl.CostEstimate(
        flops=4 * B_pad * D_pad * H_pad,           # encoder + decoder matmuls
        transcendentals=0,
        bytes_accessed=(xc.size * cbytes
                        + n_batch_tiles * (wec.size + wdc.size) * cbytes
                        + n_batch_tiles * bec.size * 4
                        + B_pad * H_pad * obytes
                        + B_pad * D_pad * obytes),
    )

    def _wspec(shape, index_map):
        if wb > 2:
            return pl.BlockSpec(shape, index_map, pipeline_mode=pl.Buffered(wb))
        return pl.BlockSpec(shape, index_map)

    in_specs = [
        pl.BlockSpec((TB, D_pad), lambda i, h: (i, 0)),   # x tile (h-resident)
        _wspec((D_pad, TH), lambda i, h: (0, h)),          # encoder W tile
        pl.BlockSpec((1, TH), lambda i, h: (0, h)),        # encoder bias tile
        _wspec((TH, D_pad), lambda i, h: (h, 0)),          # decoder W tile
    ]
    out_specs = [
        pl.BlockSpec((TB, TH), lambda i, h: (i, h)),       # features
        pl.BlockSpec((TB, D_pad), lambda i, h: (i, 0)),    # reconstruction
    ]

    if use_scratch:
        kernel = _sae_kernel_scratch
        scratch_shapes = [pltpu.VMEM((TB, D_pad), jnp.float32)]
    else:
        kernel = _sae_kernel_direct
        scratch_shapes = []

    feats, rec = pl.pallas_call(
        kernel,
        out_shape=(
            jax.ShapeDtypeStruct((B_pad, H_pad), out_dtype),
            jax.ShapeDtypeStruct((B_pad, D_pad), out_dtype),
        ),
        grid_spec=pltpu.PrefetchScalarGridSpec(
            num_scalar_prefetch=0,
            grid=grid,
            in_specs=in_specs,
            out_specs=out_specs,
            scratch_shapes=scratch_shapes,
        ),
        compiler_params=pltpu.CompilerParams(
            dimension_semantics=("parallel", "arbitrary"),
            vmem_limit_bytes=vmem_limit,
        ),
        cost_estimate=cost,
    )(xc, wec, bec, wdc)

    return feats[:B, :H], rec[:B, :D_in]


if __name__ == "__main__":
    # Small shapes that still exercise the hidden-axis reduction (>=2 h tiles
    # on every generation) without forcing padding of the lane dimension.
    B, D_IN, HID = 384, 128, 2048
    key = jax.random.PRNGKey(0)
    kx, ke, kb, kd = jax.random.split(key, 4)

    x = jax.random.normal(kx, (B, D_IN), dtype=jnp.float32)
    # PyTorch-like uniform +-1/sqrt(fan_in) init, stored pre-transposed (in, out).
    w_enc = jax.random.uniform(ke, (D_IN, HID), dtype=jnp.float32,
                               minval=-1.0 / jnp.sqrt(D_IN),
                               maxval=1.0 / jnp.sqrt(D_IN))
    b_enc = jax.random.uniform(kb, (HID,), dtype=jnp.float32,
                               minval=-1.0 / jnp.sqrt(D_IN),
                               maxval=1.0 / jnp.sqrt(D_IN))
    w_dec = jax.random.uniform(kd, (HID, D_IN), dtype=jnp.float32,
                               minval=-1.0 / jnp.sqrt(HID),
                               maxval=1.0 / jnp.sqrt(HID))

    fwd = jax.jit(sparse_autoencoder_forward)

    # Pure-JAX f32 reference (kernel computes in bf16 with f32 accumulation,
    # so tolerances are correspondingly loose).
    ref_feats = jnp.maximum(x @ w_enc + b_enc, 0.0)
    ref_rec = ref_feats @ w_dec

    # Path 1: f32 inputs -> direct output-block accumulation (no scratch).
    feats, rec = fwd(x, w_enc, b_enc, w_dec)
    jax.block_until_ready((feats, rec))
    assert feats.shape == (B, HID) and rec.shape == (B, D_IN)
    assert feats.dtype == jnp.float32 and rec.dtype == jnp.float32
    assert float(jnp.max(jnp.abs(feats - ref_feats))) < 5e-2
    assert float(jnp.max(jnp.abs(rec - ref_rec))) < 8e-2

    # Path 2: bf16 inputs/outputs -> f32 VMEM scratch accumulator.
    feats16, rec16 = fwd(x.astype(jnp.bfloat16), w_enc.astype(jnp.bfloat16),
                         b_enc, w_dec.astype(jnp.bfloat16))
    jax.block_until_ready((feats16, rec16))
    assert feats16.dtype == jnp.bfloat16 and rec16.dtype == jnp.bfloat16
    assert float(jnp.max(jnp.abs(feats16.astype(jnp.float32) - ref_feats))) < 1e-1
    assert float(jnp.max(jnp.abs(rec16.astype(jnp.float32) - ref_rec))) < 1.5e-1

    print("KERNEL_OK")
</pallas_src>

<mosaic_0001>
module attributes {stable_mosaic.version = 11 : i64} {
  func.func @_sae_kernel_direct(%arg0: i32, %arg1: i32, %arg2: memref<384x128xbf16, #tpu.memory_space<vmem>>, %arg3: memref<128x512xbf16, #tpu.memory_space<vmem>>, %arg4: memref<1x512xf32, #tpu.memory_space<vmem>>, %arg5: memref<512x128xbf16, #tpu.memory_space<vmem>>, %arg6: memref<384x512xf32, #tpu.memory_space<vmem>>, %arg7: memref<384x128xf32, #tpu.memory_space<vmem>>) attributes {dimension_semantics = [#tpu.dimension_semantics<parallel>, #tpu.dimension_semantics<arbitrary>], iteration_bounds = array<i64: 1, 4>, scalar_prefetch = 0 : i64, scratch_operands = 0 : i64, tpu.core_type = #tpu.core_type<tc>, window_params = [{transform_indices = @transform_0, window_bounds = array<i64: 384, 128>}, {transform_indices = @transform_1, window_bounds = array<i64: 128, 512>}, {transform_indices = @transform_2, window_bounds = array<i64: 1, 512>}, {transform_indices = @transform_3, window_bounds = array<i64: 512, 128>}, {transform_indices = @transform_4, window_bounds = array<i64: 384, 512>}, {transform_indices = @transform_5, window_bounds = array<i64: 384, 128>}]} {
    %c0 = arith.constant 0 : index
    %c0_0 = arith.constant 0 : index
    %0 = vector.load %arg2[%c0, %c0_0] : memref<384x128xbf16, #tpu.memory_space<vmem>>, vector<384x128xbf16>
    %c0_1 = arith.constant 0 : index
    %c0_2 = arith.constant 0 : index
    %1 = vector.load %arg3[%c0_1, %c0_2] : memref<128x512xbf16, #tpu.memory_space<vmem>>, vector<128x512xbf16>
    %cst = arith.constant dense<0.000000e+00> : vector<384x512xf32>
    %2 = tpu.matmul %0, %1, %cst {dimension_numbers = #tpu.dot_dimension_numbers<[1], [0], [0], [1], [0, 0, 1, 1], [], []>} : vector<384x128xbf16>, vector<128x512xbf16>, vector<384x512xf32> -> vector<384x512xf32>
    %c0_3 = arith.constant 0 : index
    %c0_4 = arith.constant 0 : index
    %3 = vector.load %arg4[%c0_3, %c0_4] : memref<1x512xf32, #tpu.memory_space<vmem>>, vector<1x512xf32>
    %4 = vector.broadcast %3 : vector<1x512xf32> to vector<384x512xf32>
    %5 = arith.addf %2, %4 : vector<384x512xf32>
    %cst_5 = arith.constant 0.000000e+00 : f32
    %6 = vector.broadcast %cst_5 : f32 to vector<384x512xf32>
    %7 = arith.maximumf %5, %6 : vector<384x512xf32>
    %8 = arith.truncf %7 : vector<384x512xf32> to vector<384x512xbf16>
    %c0_6 = arith.constant 0 : index
    %c0_7 = arith.constant 0 : index
    %9 = vector.load %arg6[%c0_6, %c0_7] : memref<384x512xf32, #tpu.memory_space<vmem>>, vector<384x512xf32>
    tpu.vector_store %arg6[%c0_6, %c0_7], %7 {strides = array<i32>} : memref<384x512xf32, #tpu.memory_space<vmem>>, vector<384x512xf32>,
    %c0_8 = arith.constant 0 : index
    %c0_9 = arith.constant 0 : index
    %10 = vector.load %arg5[%c0_8, %c0_9] : memref<512x128xbf16, #tpu.memory_space<vmem>>, vector<512x128xbf16>
    %cst_10 = arith.constant dense<0.000000e+00> : vector<384x128xf32>
    %11 = tpu.matmul %8, %10, %cst_10 {dimension_numbers = #tpu.dot_dimension_numbers<[1], [0], [0], [1], [0, 0, 1, 1], [], []>} : vector<384x512xbf16>, vector<512x128xbf16>, vector<384x128xf32> -> vector<384x128xf32>
    %c0_i32 = arith.constant 0 : i32
    %12 = arith.cmpi eq, %arg1, %c0_i32 : i32
    %13 = arith.extui %12 : i1 to i32
    %c0_i32_11 = arith.constant 0 : i32
    %14 = arith.cmpi ne, %13, %c0_i32_11 : i32
    scf.if %14 {
      %c0_14 = arith.constant 0 : index
      %c0_15 = arith.constant 0 : index
      %18 = vector.load %arg7[%c0_14, %c0_15] : memref<384x128xf32, #tpu.memory_space<vmem>>, vector<384x128xf32>
      tpu.vector_store %arg7[%c0_14, %c0_15], %11 {strides = array<i32>} : memref<384x128xf32, #tpu.memory_space<vmem>>, vector<384x128xf32>,
    } else {
    }
    %c0_i32_12 = arith.constant 0 : i32
    %15 = arith.cmpi sgt, %arg1, %c0_i32_12 : i32
    %16 = arith.extui %15 : i1 to i32
    %c0_i32_13 = arith.constant 0 : i32
    %17 = arith.cmpi ne, %16, %c0_i32_13 : i32
    scf.if %17 {
      %c0_14 = arith.constant 0 : index
      %c0_15 = arith.constant 0 : index
      %18 = vector.load %arg7[%c0_14, %c0_15] : memref<384x128xf32, #tpu.memory_space<vmem>>, vector<384x128xf32>
      %19 = arith.addf %18, %11 : vector<384x128xf32>
      %c0_16 = arith.constant 0 : index
      %c0_17 = arith.constant 0 : index
      %20 = vector.load %arg7[%c0_16, %c0_17] : memref<384x128xf32, #tpu.memory_space<vmem>>, vector<384x128xf32>
      tpu.vector_store %arg7[%c0_16, %c0_17], %19 {strides = array<i32>} : memref<384x128xf32, #tpu.memory_space<vmem>>, vector<384x128xf32>,
    } else {
    }
    return
  }
  func.func @transform_0(%arg0: i32, %arg1: i32) -> (i32, i32) {
    %c0_i32 = arith.constant 0 : i32
    %c0_i32_0 = arith.constant 0 : i32
    return %arg0, %c0_i32 : i32, i32
  }
  func.func @transform_1(%arg0: i32, %arg1: i32) -> (i32, i32) {
    %c0_i32 = arith.constant 0 : i32
    %c0_i32_0 = arith.constant 0 : i32
    return %c0_i32, %arg1 : i32, i32
  }
  func.func @transform_2(%arg0: i32, %arg1: i32) -> (i32, i32) {
    %c0_i32 = arith.constant 0 : i32
    %c0_i32_0 = arith.constant 0 : i32
    return %c0_i32, %arg1 : i32, i32
  }
  func.func @transform_3(%arg0: i32, %arg1: i32) -> (i32, i32) {
    %c0_i32 = arith.constant 0 : i32
    %c0_i32_0 = arith.constant 0 : i32
    return %arg1, %c0_i32 : i32, i32
  }
  func.func @transform_4(%arg0: i32, %arg1: i32) -> (i32, i32) {
    %c0_i32 = arith.constant 0 : i32
    return %arg0, %arg1 : i32, i32
  }
  func.func @transform_5(%arg0: i32, %arg1: i32) -> (i32, i32) {
    %c0_i32 = arith.constant 0 : i32
    %c0_i32_0 = arith.constant 0 : i32
    return %arg0, %c0_i32 : i32, i32
  }
}

</mosaic_0001>

<bundles_post_ra>
// kernel: sparse_autoencoder_forward.1
= control target key start
LH: loop header
LB: loop body
LE: loop exit
PB: predicated region body
PF: predicated region fallthrough
CT: control target
= control target key end

     0   :  { %11 = vsyncpa [#allocation4], 0  ;;  %s4340_s0 = inlined_call_operand.vmem [shape: bf16[384,128], index: 0, kind: input, shape index: {}]   ;;  %s4341_s1 = inlined_call_operand.vmem [shape: bf16[128,2048], index: 1, kind: input, shape index: {}]   ;;  %s4342_s2 = inlined_call_operand.vmem [shape: f32[1,2048], index: 2, kind: input, shape index: {}]   ;;  %s4343_s3 = inlined_call_operand.vmem [shape: bf16[2048,128], index: 3, kind: input, shape index: {}]   ;;  %s4344_s4 = inlined_call_operand.hbm [shape: f32[384,2048], index: 4, kind: output, shape index: {0}]   ;;  %s4345_s5 = inlined_call_operand.hbm [shape: f32[384,128], index: 5, kind: output, shape index: {1}]  }
   0x1   :  { %13 = vsyncpa [#allocation4 + $0x1], 0 }
   0x2   :  { %14 = vsyncpa [#allocation6], 0  ;;  %s3318_s18 = smov 0   ;;  %s3320_s19 = smov 0  }
   0x3   :  { %s3322_s20 = smov 0   ;;  %s3324_s21 = smov 0  }
   0x4   :  { %s3326_s22 = smov 0   ;;  %s3328_s23 = smov 0  }
   0x5 LB: > { %s2890_s24 = sadd.s32 4294967295, %s3278_s23   ;;  %s2891_s25 = sadd.s32 4294967294, %s3278_s23   ;;  %s3278_s23 = sphi %s3328_s23, %s20_s23   ;;  %s3274_s22 = sphi %s3326_s22, %s4353_s22   ;;  %s3270_s21 = sphi %s3324_s21, %s4352_s21   ;;  %s3266_s20 = sphi %s3322_s20, %s4351_s20   ;;  %s3262_s19 = sphi %s3320_s19, %s4350_s19   ;;  %s3258_s18 = sphi %s3318_s18, %s4349_s18  }
   0x6   : > { %s29_s26 = sadd.s32 1, %s3274_s22  ;;  %s65_s27 = sadd.s32 1, %s3266_s20 }
   0x7   : > { %p30_p0 = scmp.ge.s32.totalorder %s29_s26, 4  ;;  %p72_p1 = scmp.ne.s32.totalorder %s3266_s20, %s3262_s19 }
   0x8   : > { %p73_p2 = scmp.eq.s32.totalorder %s3278_s23, 0  ;;  %p3355_p3 = scmp.eq.s32.totalorder %s2890_s24, 3 }
   0x9   : > { %s4355_s26 = smov (%p30_p0, %s29_s26), 0  ;;  %p161_p6 = scmp.ne.s32.totalorder %s3262_s19, %s3258_s18 }
   0xa   : > { %p74_p4 = por %p73_p2, %p72_p1  ;;  %p3363_p5 = por %p3355_p3, %p72_p1 }
   0xb   : > { %s62_s30 = ssub.s32 %s3274_s22, %s4355_s26  ;;  %p162_p8 = scmp.eq.s32.totalorder %s2891_s25, 3 }
   0xc   : > { %p63_p7 = scmp.eq.s32.totalorder %s62_s30, 0  ;;  %p2894_p10 = scmp.ge.s32.totalorder %s3278_s23, 4 }
   0xd   : > { %p3374_p9 = por %p162_p8, %p161_p6 }
   0xe   : > { %s3372_s6 = scalar_select %p63_p7, %s3266_s20, %s65_s27  }
   0xf   : > { %213 = sbr.rel (%p2894_p10) target bundleno = 40 (0x28), region = 20 }
  0x14   : > { %216 = sbr.rel (!%p74_p4) target bundleno = 40 (0x28), region = 24  ;;  %s218_s8 = sand.u32 (%p74_p4), 1, %s3266_s20  }
  0x15   : > { %s2999_s9 = sshll.u32 (%p74_p4), %s3274_s22, 4  ;;  %s2895_s10 = sshll.u32 (%p74_p4), %s218_s8, 8 }
  0x16   : > { %s3384_s13 = scalar_lea.vmem (%p74_p4), %s4341_s1, %s2999_s9  ;;  %s3389_s14 = scalar_lea.vmem (%p74_p4), [#allocation2], %s2895_s10 }
  0x17   : > { %v236_v0 = vld [vmem:[%s3384_s13] sm:$0xff] (%p74_p4)  ;;  %v238_v1 = vld [vmem:[%s3384_s13 + $0x8] sm:$0xff] (%p74_p4) }
  0x18   : > { %v240_v2 = vld [vmem:[%s3384_s13 + $0x40] sm:$0xff] (%p74_p4)  ;;  %237 = vst [vmem:[%s3389_s14] sm:$0xff] (%p74_p4), %v236_v0  ;;  %239 = vst [vmem:[%s3389_s14 + $0x8] sm:$0xff] (%p74_p4), %v238_v1  ;;  %v242_v3 = vld [vmem:[%s3384_s13 + $0x48] sm:$0xff] (%p74_p4) }
  0x19   : > { %241 = vst [vmem:[%s3389_s14 + $0x10] sm:$0xff] %v240_v2  ;;  %v244_v4 = vld [vmem:[%s3384_s13 + $0x80] sm:$0xff]  ;;  %v246_v5 = vld [vmem:[%s3384_s13 + $0x88] sm:$0xff]  ;;  %243 = vst [vmem:[%s3389_s14 + $0x18] sm:$0xff] %v242_v3 }
  0x1a   : > { %245 = vst [vmem:[%s3389_s14 + $0x20] sm:$0xff] %v244_v4  ;;  %247 = vst [vmem:[%s3389_s14 + $0x28] sm:$0xff] %v246_v5  ;;  %v248_v6 = vld [vmem:[%s3384_s13 + $0xc0] sm:$0xff]  ;;  %v250_v7 = vld [vmem:[%s3384_s13 + $0xc8] sm:$0xff] }
  0x1b   : > { %v252_v8 = vld [vmem:[%s3384_s13 + $0x100] sm:$0xff]  ;;  %249 = vst [vmem:[%s3389_s14 + $0x30] sm:$0xff] %v248_v6  ;;  %251 = vst [vmem:[%s3389_s14 + $0x38] sm:$0xff] %v250_v7  ;;  %v254_v9 = vld [vmem:[%s3384_s13 + $0x108] sm:$0xff] }
  0x1c   : > { %253 = vst [vmem:[%s3389_s14 + $0x40] sm:$0xff] %v252_v8  ;;  %v256_v10 = vld [vmem:[%s3384_s13 + $0x140] sm:$0xff]  ;;  %v258_v11 = vld [vmem:[%s3384_s13 + $0x148] sm:$0xff]  ;;  %255 = vst [vmem:[%s3389_s14 + $0x48] sm:$0xff] %v254_v9 }
  0x1d   : > { %257 = vst [vmem:[%s3389_s14 + $0x50] sm:$0xff] %v256_v10  ;;  %259 = vst [vmem:[%s3389_s14 + $0x58] sm:$0xff] %v258_v11  ;;  %v260_v12 = vld [vmem:[%s3384_s13 + $0x180] sm:$0xff]  ;;  %v262_v13 = vld [vmem:[%s3384_s13 + $0x188] sm:$0xff] }
  0x1e   : > { %v264_v14 = vld [vmem:[%s3384_s13 + $0x1c0] sm:$0xff]  ;;  %261 = vst [vmem:[%s3389_s14 + $0x60] sm:$0xff] %v260_v12  ;;  %263 = vst [vmem:[%s3389_s14 + $0x68] sm:$0xff] %v262_v13  ;;  %v266_v15 = vld [vmem:[%s3384_s13 + $0x1c8] sm:$0xff] }
  0x1f   : > { %265 = vst [vmem:[%s3389_s14 + $0x70] sm:$0xff] %v264_v14  ;;  %v268_v16 = vld [vmem:[%s3384_s13 + $0x200] sm:$0xff]  ;;  %v270_v17 = vld [vmem:[%s3384_s13 + $0x208] sm:$0xff]  ;;  %267 = vst [vmem:[%s3389_s14 + $0x78] sm:$0xff] %v266_v15 }
  0x20   : > { %269 = vst [vmem:[%s3389_s14 + $0x80] sm:$0xff] %v268_v16  ;;  %271 = vst [vmem:[%s3389_s14 + $0x88] sm:$0xff] %v270_v17  ;;  %v272_v18 = vld [vmem:[%s3384_s13 + $0x240] sm:$0xff]  ;;  %v274_v19 = vld [vmem:[%s3384_s13 + $0x248] sm:$0xff] }
  0x21   : > { %v276_v20 = vld [vmem:[%s3384_s13 + $0x280] sm:$0xff]  ;;  %273 = vst [vmem:[%s3389_s14 + $0x90] sm:$0xff] %v272_v18  ;;  %275 = vst [vmem:[%s3389_s14 + $0x98] sm:$0xff] %v274_v19  ;;  %v278_v21 = vld [vmem:[%s3384_s13 + $0x288] sm:$0xff] }
  0x22   : > { %277 = vst [vmem:[%s3389_s14 + $0xa0] sm:$0xff] %v276_v20  ;;  %v280_v22 = vld [vmem:[%s3384_s13 + $0x2c0] sm:$0xff]  ;;  %v282_v23 = vld [vmem:[%s3384_s13 + $0x2c8] sm:$0xff]  ;;  %279 = vst [vmem:[%s3389_s14 + $0xa8] sm:$0xff] %v278_v21 }
  0x23   : > { %281 = vst [vmem:[%s3389_s14 + $0xb0] sm:$0xff] %v280_v22  ;;  %283 = vst [vmem:[%s3389_s14 + $0xb8] sm:$0xff] %v282_v23  ;;  %v284_v24 = vld [vmem:[%s3384_s13 + $0x300] sm:$0xff]  ;;  %v286_v25 = vld [vmem:[%s3384_s13 + $0x308] sm:$0xff] }
  0x24   : > { %v288_v26 = vld [vmem:[%s3384_s13 + $0x340] sm:$0xff]  ;;  %285 = vst [vmem:[%s3389_s14 + $0xc0] sm:$0xff] %v284_v24  ;;  %287 = vst [vmem:[%s3389_s14 + $0xc8] sm:$0xff] %v286_v25  ;;  %v290_v27 = vld [vmem:[%s3384_s13 + $0x348] sm:$0xff] }
  0x25   : > { %289 = vst [vmem:[%s3389_s14 + $0xd0] sm:$0xff] %v288_v26  ;;  %v292_v28 = vld [vmem:[%s3384_s13 + $0x380] sm:$0xff]  ;;  %v294_v29 = vld [vmem:[%s3384_s13 + $0x388] sm:$0xff]  ;;  %291 = vst [vmem:[%s3389_s14 + $0xd8] sm:$0xff] %v290_v27 }
  0x26   : > { %293 = vst [vmem:[%s3389_s14 + $0xe0] sm:$0xff] %v292_v28  ;;  %295 = vst [vmem:[%s3389_s14 + $0xe8] sm:$0xff] %v294_v29  ;;  %v296_v30 = vld [vmem:[%s3384_s13 + $0x3c0] sm:$0xff]  ;;  %v298_v31 = vld [vmem:[%s3384_s13 + $0x3c8] sm:$0xff] }
  0x27   : > { %297 = vst [vmem:[%s3389_s14 + $0xf0] sm:$0xff] %v296_v30  ;;  %299 = vst [vmem:[%s3389_s14 + $0xf8] sm:$0xff] %v298_v31 }
  0x28 PF: > { %p2898_p11 = scmp.ge.s32.totalorder %s3278_s23, 1  ;;  %p321_p12 = scmp.lt.s32.totalorder %s3278_s23, 5 }
  0x2a   : > { %p322_p13 = pnand %p2898_p11, %p321_p12 }
  0x2b   : > { %s3455_s15 = sand.u32 (!%p322_p13), 1, %s3262_s19   ;;  %s2901_s24 = sshll.u32 (!%p322_p13), %s3270_s21, 6 }
  0x2c   : > { %325 = sbr.rel (%p322_p13) target bundleno = 771 (0x303), region = 55  ;;  %s2899_s16 = sshll.u32 (!%p322_p13), %s3455_s15, 8 }
  0x2d   : > { %s3460_s17 = scalar_lea.vmem (!%p322_p13), [#allocation2], %s2899_s16  ;;  %p382_p0 = scmp.lt.s32.totalorder (!%p322_p13), %s2901_s24, 255 }
  0x2e   : > { %s3001_s10 = smul.u32 (!%p322_p13), 1536, %s3455_s15  ;;  %p2991_p2 = scmp.ne.s32.totalorder (!%p322_p13), %s3270_s21, 0 }
  0x30   : > { %s3699_s11 = scalar_lea.vmem (!%p322_p13), [#allocation3], %s3001_s10 }
  0x31   : > { %v3280_v32 = vmov 0   ;;  %v3070_v33 = vld [vmem:[%s3460_s17 + $0xe4] ss:$16 sps:$4 sm:$0xff]   ;;  %v3072_v34 = vld [vmem:[%s3460_s17 + $0xec] ss:$16 sps:$4 sm:$0xff]   ;;  %s4357_s24 = smov (!%p382_p0, %s2901_s24), 255 }
  0x32   : > { %829 = vmatprep.mubr.bf16.mxu0 %v3280_v32  ;;  %1102 = vmatprep.mubr.bf16.mxu1 %v3280_v32  ;;  %v3074_v35 = vld [vmem:[%s3460_s17 + $0xe0] ss:$16 sps:$4 sm:$0xff]   ;;  %v3075_v36 = vld [vmem:[%s3460_s17 + $0xe8] ss:$16 sps:$4 sm:$0xff]   ;;  %v3076_v37 = vld [vmem:[%s3460_s17 + $0xc4] ss:$16 sps:$4 sm:$0xff]  }
  0x33   : > { %797 = vmatprep.subr.bf16.mxu0 %v3070_v33  ;;  %1070 = vmatprep.subr.bf16.mxu1 %v3072_v34  ;;  %v3078_v38 = vld [vmem:[%s3460_s17 + $0xcc] ss:$16 sps:$4 sm:$0xff]   ;;  %v3080_v39 = vld [vmem:[%s3460_s17 + $0xc0] ss:$16 sps:$4 sm:$0xff]   ;;  %v3081_v40 = vld [vmem:[%s3460_s17 + $0xc8] ss:$16 sps:$4 sm:$0xff]  }
  0x34   : > { %798 = vmatpush1.bf16.msra.mxu0 %v3074_v35  ;;  %1071 = vmatpush1.bf16.msra.mxu1 %v3075_v36  ;;  %v3082_v41 = vld [vmem:[%s3460_s17 + $0xa4] ss:$16 sps:$4 sm:$0xff]   ;;  %v3084_v42 = vld [vmem:[%s3460_s17 + $0xac] ss:$16 sps:$4 sm:$0xff]   ;;  %v3086_v43 = vld [vmem:[%s3460_s17 + $0xa0] ss:$16 sps:$4 sm:$0xff]  }
  0x35   : > { %799 = vmatprep.subr.bf16.mxu0 %v3076_v37  ;;  %1072 = vmatprep.subr.bf16.mxu1 %v3078_v38  ;;  %v3087_v44 = vld [vmem:[%s3460_s17 + $0xa8] ss:$16 sps:$4 sm:$0xff]   ;;  %v3088_v45 = vld [vmem:[%s3460_s17 + $0x84] ss:$16 sps:$4 sm:$0xff]   ;;  %v3090_v46 = vld [vmem:[%s3460_s17 + $0x8c] ss:$16 sps:$4 sm:$0xff]  }
  0x36   : > { %v3092_v47 = vld [vmem:[%s3460_s17 + $0x80] ss:$16 sps:$4 sm:$0xff]   ;;  %v3093_v48 = vld [vmem:[%s3460_s17 + $0x88] ss:$16 sps:$4 sm:$0xff]   ;;  %v3094_v49 = vld [vmem:[%s3460_s17 + $0x64] ss:$16 sps:$4 sm:$0xff]  }
  0x37   : > { %v3096_v50 = vld [vmem:[%s3460_s17 + $0x6c] ss:$16 sps:$4 sm:$0xff]   ;;  %v3098_v51 = vld [vmem:[%s3460_s17 + $0x60] ss:$16 sps:$4 sm:$0xff]   ;;  %v3099_v52 = vld [vmem:[%s3460_s17 + $0x68] ss:$16 sps:$4 sm:$0xff]  }
  0x38   : > { %800 = vmatpush1.bf16.msra.mxu0 %v3080_v39  ;;  %1073 = vmatpush1.bf16.msra.mxu1 %v3081_v40  ;;  %v3100_v53 = vld [vmem:[%s3460_s17 + $0x44] ss:$16 sps:$4 sm:$0xff]   ;;  %v3102_v54 = vld [vmem:[%s3460_s17 + $0x4c] ss:$16 sps:$4 sm:$0xff]   ;;  %s2902_s25 = sshll.u32 %s4357_s24, 2  ;;  %s2900_s24 = sshll.u32 %s3270_s21, 2 }
  0x39   : > { %801 = vmatprep.subr.bf16.mxu0 %v3082_v41  ;;  %1074 = vmatprep.subr.bf16.mxu1 %v3084_v42  ;;  %v3104_v55 = vld [vmem:[%s3460_s17 + $0x40] ss:$16 sps:$4 sm:$0xff]   ;;  %v3105_v56 = vld [vmem:[%s3460_s17 + $0x48] ss:$16 sps:$4 sm:$0xff]   ;;  %v3106_v57 = vld [vmem:[%s3460_s17 + $0x24] ss:$16 sps:$4 sm:$0xff]   ;;  %s3491_s8 = scalar_lea.vmem %s4343_s3, %s2902_s25 }
  0x3a   : > { %v3108_v58 = vld [vmem:[%s3460_s17 + $0x2c] ss:$16 sps:$4 sm:$0xff]   ;;  %v3110_v59 = vld [vmem:[%s3460_s17 + $0x20] ss:$16 sps:$4 sm:$0xff]   ;;  %v3111_v60 = vld [vmem:[%s3460_s17 + $0x28] ss:$16 sps:$4 sm:$0xff]  }
  0x3b   : > { %v3112_v61 = vld [vmem:[%s3460_s17 + $0x4] ss:$16 sps:$4 sm:$0xff]   ;;  %v3114_v62 = vld [vmem:[%s3460_s17 + $0xc] ss:$16 sps:$4 sm:$0xff]   ;;  %v3116_v63 = vld [vmem:[%s3460_s17] ss:$16 sps:$4 sm:$0xff]  }
  0x3c   : > { %802 = vmatpush1.bf16.msra.mxu0 %v3086_v43  ;;  %1075 = vmatpush1.bf16.msra.mxu1 %v3087_v44  ;;  %v3117_v0 = vld [vmem:[%s3460_s17 + $0x8] ss:$16 sps:$4 sm:$0xff]   ;;  %v3118_v1 = vld [vmem:[%s4340_s0] sm:$0xff]   ;;  %v3124_v4 = vld [vmem:[%s3491_s8 + $0x30] sm:$0xff]   ;;  %p377_p1 = scmp.lt.s32.totalorder %s2900_s24, 15 }
  0x3d   : > { %803 = vmatprep.subr.bf16.mxu0 %v3088_v45  ;;  %1076 = vmatprep.subr.bf16.mxu1 %v3090_v46  ;;  %v3120_v2 = vld [vmem:[%s3491_s8 + $0x38] sm:$0xff]   ;;  %v3125_v5 = vld [vmem:[%s3491_s8 + $0xb0] sm:$0xff]   ;;  %v3119_v6 = vld [vmem:[%s4340_s0 + $0x8] sm:$0xff]  }
  0x3e   : > { %v3121_v3 = vld [vmem:[%s3491_s8 + $0xb8] sm:$0xff]   ;;  %v3127_v7 = vld [vmem:[%s3491_s8 + $0x28] sm:$0xff]   ;;  %v3131_v9 = vld [vmem:[%s3491_s8 + $0x20] sm:$0xff]   ;;  %s4359_s24 = smov (!%p377_p1, %s2900_s24), 15 }
  0x3f   : > { %v3128_v8 = vld [vmem:[%s3491_s8 + $0xa8] sm:$0xff]   ;;  %v3132_v10 = vld [vmem:[%s3491_s8 + $0xa0] sm:$0xff]   ;;  %v3122_v11 = vld [vmem:[%s4340_s0 + $0x10] sm:$0xff]   ;;  %s379_s9 = scalar_lea.vmem %s4342_s2, %s4359_s24 }
  0x40   : > { %804 = vmatpush1.bf16.msra.mxu0 %v3092_v47  ;;  %1077 = vmatpush1.bf16.msra.mxu1 %v3093_v48  ;;  %v3134_v12 = vld [vmem:[%s3491_s8 + $0x18] sm:$0xff]   ;;  %v3138_v14 = vld [vmem:[%s3491_s8 + $0x10] sm:$0xff]   ;;  %v3141_v17 = vld [vmem:[%s3491_s8 + $0x8] sm:$0xff]  }
  0x41   : > { %805 = vmatprep.subr.bf16.mxu0 %v3094_v49  ;;  %1078 = vmatprep.subr.bf16.mxu1 %v3096_v50  ;;  %v3135_v13 = vld [vmem:[%s3491_s8 + $0x98] sm:$0xff]   ;;  %v3139_v15 = vld [vmem:[%s3491_s8 + $0x90] sm:$0xff]   ;;  %v3142_v18 = vld [vmem:[%s3491_s8 + $0x88] sm:$0xff]  }
  0x42   : > { %v3123_v16 = vld [vmem:[%s4340_s0 + $0x18] sm:$0xff]   ;;  %v3145_v19 = vld [vmem:[%s3491_s8] sm:$0xff]   ;;  %v3152_v24 = vld [vmem:[%s3491_s8 + $0x70] sm:$0xff]  }
  0x43   : > { %v3146_v20 = vld [vmem:[%s3491_s8 + $0x80] sm:$0xff]   ;;  %v3148_v22 = vld [vmem:[%s3491_s8 + $0x78] sm:$0xff]   ;;  %v3153_v25 = vld [vmem:[%s3491_s8 + $0xf0] sm:$0xff]  }
  0x44   : > { %806 = vmatpush1.bf16.msra.mxu0 %v3098_v51  ;;  %1079 = vmatpush1.bf16.msra.mxu1 %v3099_v52  ;;  %v3126_v21 = vld [vmem:[%s4340_s0 + $0x20] sm:$0xff]   ;;  %v3149_v23 = vld [vmem:[%s3491_s8 + $0xf8] sm:$0xff]   ;;  %v3129_v26 = vld [vmem:[%s4340_s0 + $0x28] sm:$0xff]  }
  0x45   : > { %807 = vmatprep.subr.bf16.mxu0 %v3100_v53  ;;  %1080 = vmatprep.subr.bf16.mxu1 %v3102_v54  ;;  %v3155_v27 = vld [vmem:[%s3491_s8 + $0x68] sm:$0xff]   ;;  %v3159_v29 = vld [vmem:[%s3491_s8 + $0x60] sm:$0xff]   ;;  %v3130_v31 = vld [vmem:[%s4340_s0 + $0x30] sm:$0xff]  }
  0x46   : > { %v3156_v28 = vld [vmem:[%s3491_s8 + $0xe8] sm:$0xff]   ;;  %v3160_v30 = vld [vmem:[%s3491_s8 + $0xe0] sm:$0xff]   ;;  %v3162_v33 = vld [vmem:[%s3491_s8 + $0x58] sm:$0xff]  }
  0x47   : > { %v3163_v34 = vld [vmem:[%s3491_s8 + $0xd8] sm:$0xff]   ;;  %v3166_v35 = vld [vmem:[%s3491_s8 + $0x50] sm:$0xff]   ;;  %v3169_v38 = vld [vmem:[%s3491_s8 + $0x48] sm:$0xff]  }
  0x48   : > { %808 = vmatpush1.bf16.msra.mxu0 %v3104_v55  ;;  %1081 = vmatpush1.bf16.msra.mxu1 %v3105_v56  ;;  %v3167_v36 = vld [vmem:[%s3491_s8 + $0xd0] sm:$0xff]   ;;  %v3133_v37 = vld [vmem:[%s4340_s0 + $0x38] sm:$0xff]   ;;  %v3170_v39 = vld [vmem:[%s3491_s8 + $0xc8] sm:$0xff]  }
  0x49   : > { %809 = vmatprep.subr.bf16.mxu0 %v3106_v57  ;;  %1082 = vmatprep.subr.bf16.mxu1 %v3108_v58  ;;  %v3136_v40 = vld [vmem:[%s4340_s0 + $0x40] sm:$0xff]   ;;  %v3137_v41 = vld [vmem:[%s4340_s0 + $0x48] sm:$0xff]   ;;  %v3140_v44 = vld [vmem:[%s4340_s0 + $0x50] sm:$0xff]   ;;  %v473_v57 = vlaneseq }
  0x4a   : > { %v3172_v42 = vld [vmem:[%s3491_s8 + $0x40] sm:$0xff]   ;;  %v3143_v45 = vld [vmem:[%s4340_s0 + $0x58] sm:$0xff]   ;;  %v3147_v47 = vld [vmem:[%s4340_s0 + $0x68] sm:$0xff]  }
  0x4b   : > { %v3173_v43 = vld [vmem:[%s3491_s8 + $0xc0] sm:$0xff]   ;;  %v3150_v48 = vld [vmem:[%s4340_s0 + $0x70] sm:$0xff]   ;;  %v3151_v49 = vld [vmem:[%s4340_s0 + $0x78] sm:$0xff]  }
  0x4c   : > { %810 = vmatpush1.bf16.msra.mxu0 %v3110_v59  ;;  %1083 = vmatpush1.bf16.msra.mxu1 %v3111_v60  ;;  %v3144_v46 = vld [vmem:[%s4340_s0 + $0x60] sm:$0xff]   ;;  %v3157_v51 = vld [vmem:[%s4340_s0 + $0x88] sm:$0xff]   ;;  %v3158_v52 = vld [vmem:[%s4340_s0 + $0x90] sm:$0xff]   ;;  %v474_v59 = vshrl.u32 %v473_v57, 7 }
  0x4d   : > { %811 = vmatprep.subr.bf16.mxu0 %v3112_v61  ;;  %1084 = vmatprep.subr.bf16.mxu1 %v3114_v62  ;;  %v3154_v50 = vld [vmem:[%s4340_s0 + $0x80] sm:$0xff]   ;;  %v3161_v53 = vld [vmem:[%s4340_s0 + $0x98] sm:$0xff]   ;;  %v3165_v55 = vld [vmem:[%s4340_s0 + $0xa8] sm:$0xff]  }
  0x4e   : > { %v3164_v54 = vld [vmem:[%s4340_s0 + $0xa0] sm:$0xff]   ;;  %v3168_v56 = vld [vmem:[%s4340_s0 + $0xb0] sm:$0xff]   ;;  %v3171_v58 = vld [vmem:[%s4340_s0 + $0xb8] sm:$0xff]   ;;  %v475_v60 = vsub.s32 0, %v474_v59  ;;  %v483_v61 = vsub.s32 2, %v474_v59 }
  0x4f   : > { %v471_v62 = vld [vmem:[%s379_s9] sm:$0xf] }
  0x50   : > { %812 = vmatpush1.bf16.msra.mxu0 %v3116_v63  ;;  %1085 = vmatpush1.bf16.msra.mxu1 %v3117_v0  ;;  %v479_v63 = vsub.s32 1, %v474_v59  ;;  %v487_v0 = vsub.s32 3, %v474_v59 }
  0x51   : > { %2079 = vmatprep.subr.bf16.mxu0 %v3280_v32  ;;  %2304 = vmatprep.subr.bf16.mxu1 %v3280_v32 }
  0x53   : > { %830 = vmatmul.mubr.bf16.vlgmr.msra.gmra.mxu0 %v3118_v1  ;;  %1103 = vmatmul.mubr.bf16.vlgmr.msra.gmra.mxu1 %v3118_v1  ;;  %v3686_v1 = vrot.slane %v471_v62, %v475_v60 }
  0x54   : > { %839 = vmatprep.mubr.bf16.mxu0 %v3280_v32  ;;  %1112 = vmatprep.mubr.bf16.mxu1 %v3280_v32 }
  0x55   : > { %2080 = vmatpush1.bf16.msra.mxu0 %v3120_v2  ;;  %2305 = vmatpush1.bf16.msra.mxu1 %v3121_v3  ;;  %v3691_v2 = vrot.slane %v471_v62, %v479_v63  ;;  %v3693_v3 = vrot.slane %v471_v62, %v487_v0 }
  0x56   : > { %2081 = vmatprep.subr.bf16.mxu0 %v3280_v32  ;;  %2306 = vmatprep.subr.bf16.mxu1 %v3280_v32 }
  0x59   : > { %2082 = vmatpush1.bf16.msra.mxu0 %v3124_v4  ;;  %2307 = vmatpush1.bf16.msra.mxu1 %v3125_v5 }
  0x5a   : > { %2083 = vmatprep.subr.bf16.mxu0 %v3280_v32  ;;  %2308 = vmatprep.subr.bf16.mxu1 %v3280_v32 }
  0x5b   : > { %840 = vmatmul.mubr.bf16.gmra.mxu0 %v3119_v6  ;;  %1113 = vmatmul.mubr.bf16.gmra.mxu1 %v3119_v6 }
  0x5c   : > { %849 = vmatprep.mubr.bf16.mxu0 %v3280_v32  ;;  %1122 = vmatprep.mubr.bf16.mxu1 %v3280_v32 }
  0x5d   : > { %2084 = vmatpush1.bf16.msra.mxu0 %v3127_v7  ;;  %2309 = vmatpush1.bf16.msra.mxu1 %v3128_v8 }
  0x5e   : > { %2085 = vmatprep.subr.bf16.mxu0 %v3280_v32  ;;  %2310 = vmatprep.subr.bf16.mxu1 %v3280_v32 }
  0x61   : > { %2086 = vmatpush1.bf16.msra.mxu0 %v3131_v9  ;;  %2311 = vmatpush1.bf16.msra.mxu1 %v3132_v10 }
  0x62   : > { %2087 = vmatprep.subr.bf16.mxu0 %v3280_v32  ;;  %2312 = vmatprep.subr.bf16.mxu1 %v3280_v32 }
  0x63   : > { %850 = vmatmul.mubr.bf16.gmra.mxu0 %v3122_v11  ;;  %1123 = vmatmul.mubr.bf16.gmra.mxu1 %v3122_v11 }
  0x64   : > { %859 = vmatprep.mubr.bf16.mxu0 %v3280_v32  ;;  %1132 = vmatprep.mubr.bf16.mxu1 %v3280_v32 }
  0x65   : > { %2088 = vmatpush1.bf16.msra.mxu0 %v3134_v12  ;;  %2313 = vmatpush1.bf16.msra.mxu1 %v3135_v13 }
  0x66   : > { %2089 = vmatprep.subr.bf16.mxu0 %v3280_v32  ;;  %2314 = vmatprep.subr.bf16.mxu1 %v3280_v32 }
  0x69   : > { %2090 = vmatpush1.bf16.msra.mxu0 %v3138_v14  ;;  %2315 = vmatpush1.bf16.msra.mxu1 %v3139_v15 }
  0x6a   : > { %2091 = vmatprep.subr.bf16.mxu0 %v3280_v32  ;;  %2316 = vmatprep.subr.bf16.mxu1 %v3280_v32 }
  0x6b   : > { %860 = vmatmul.mubr.bf16.gmra.mxu0 %v3123_v16  ;;  %1133 = vmatmul.mubr.bf16.gmra.mxu1 %v3123_v16 }
  0x6c   : > { %869 = vmatprep.mubr.bf16.mxu0 %v3280_v32  ;;  %1142 = vmatprep.mubr.bf16.mxu1 %v3280_v32 }
  0x6d   : > { %2092 = vmatpush1.bf16.msra.mxu0 %v3141_v17  ;;  %2317 = vmatpush1.bf16.msra.mxu1 %v3142_v18 }
  0x6e   : > { %2093 = vmatprep.subr.bf16.mxu0 %v3280_v32  ;;  %2318 = vmatprep.subr.bf16.mxu1 %v3280_v32 }
  0x71   : > { %2094 = vmatpush1.bf16.msra.mxu0 %v3145_v19  ;;  %2319 = vmatpush1.bf16.msra.mxu1 %v3146_v20 }
  0x72   : > { %2095 = vmatprep.subr.bf16.mxu0 %v3280_v32  ;;  %2320 = vmatprep.subr.bf16.mxu1 %v3280_v32 }
  0x73   : > { %870 = vmatmul.mubr.bf16.gmra.mxu0 %v3126_v21  ;;  %1143 = vmatmul.mubr.bf16.gmra.mxu1 %v3126_v21 }
  0x74   : > { %879 = vmatprep.mubr.bf16.mxu0 %v3280_v32  ;;  %1152 = vmatprep.mubr.bf16.mxu1 %v3280_v32 }
  0x75   : > { %2096 = vmatpush2.bf16.msra.mxu0 %v3148_v22  ;;  %2321 = vmatpush2.bf16.msra.mxu1 %v3149_v23 }
  0x76   : > { %2097 = vmatprep.subr.bf16.mxu0 %v3280_v32  ;;  %2322 = vmatprep.subr.bf16.mxu1 %v3280_v32 }
  0x79   : > { %2098 = vmatpush2.bf16.msra.mxu0 %v3152_v24  ;;  %2323 = vmatpush2.bf16.msra.mxu1 %v3153_v25 }
  0x7a   : > { %2099 = vmatprep.subr.bf16.mxu0 %v3280_v32  ;;  %2324 = vmatprep.subr.bf16.mxu1 %v3280_v32 }
  0x7b   : > { %880 = vmatmul.mubr.bf16.gmra.mxu0 %v3129_v26  ;;  %1153 = vmatmul.mubr.bf16.gmra.mxu1 %v3129_v26 }
  0x7c   : > { %889 = vmatprep.mubr.bf16.mxu0 %v3280_v32  ;;  %1162 = vmatprep.mubr.bf16.mxu1 %v3280_v32 }
  0x7d   : > { %2100 = vmatpush2.bf16.msra.mxu0 %v3155_v27  ;;  %2325 = vmatpush2.bf16.msra.mxu1 %v3156_v28 }
  0x7e   : > { %2101 = vmatprep.subr.bf16.mxu0 %v3280_v32  ;;  %2326 = vmatprep.subr.bf16.mxu1 %v3280_v32 }
  0x81   : > { %2102 = vmatpush2.bf16.msra.mxu0 %v3159_v29  ;;  %2327 = vmatpush2.bf16.msra.mxu1 %v3160_v30 }
  0x82   : > { %2103 = vmatprep.subr.bf16.mxu0 %v3280_v32  ;;  %2328 = vmatprep.subr.bf16.mxu1 %v3280_v32 }
  0x83   : > { %890 = vmatmul.mubr.bf16.gmra.mxu0 %v3130_v31  ;;  %1163 = vmatmul.mubr.bf16.gmra.mxu1 %v3130_v31 }
  0x84   : > { %899 = vmatprep.mubr.bf16.mxu0 %v3280_v32  ;;  %1172 = vmatprep.mubr.bf16.mxu1 %v3280_v32 }
  0x85   : > { %2104 = vmatpush2.bf16.msra.mxu0 %v3162_v33  ;;  %2329 = vmatpush2.bf16.msra.mxu1 %v3163_v34 }
  0x86   : > { %2105 = vmatprep.subr.bf16.mxu0 %v3280_v32  ;;  %2330 = vmatprep.subr.bf16.mxu1 %v3280_v32 }
  0x89   : > { %2106 = vmatpush2.bf16.msra.mxu0 %v3166_v35  ;;  %2331 = vmatpush2.bf16.msra.mxu1 %v3167_v36 }
  0x8a   : > { %2107 = vmatprep.subr.bf16.mxu0 %v3280_v32  ;;  %2332 = vmatprep.subr.bf16.mxu1 %v3280_v32 }
  0x8b   : > { %900 = vmatmul.mubr.bf16.gmra.mxu0 %v3133_v37  ;;  %1173 = vmatmul.mubr.bf16.gmra.mxu1 %v3133_v37 }
  0x8c   : > { %909 = vmatprep.mubr.bf16.mxu0 %v3280_v32  ;;  %1182 = vmatprep.mubr.bf16.mxu1 %v3280_v32 }
  0x8d   : > { %2108 = vmatpush2.bf16.msra.mxu0 %v3169_v38  ;;  %2333 = vmatpush2.bf16.msra.mxu1 %v3170_v39 }
  0x8e   : > { %2109 = vmatprep.subr.bf16.mxu0 %v3280_v32  ;;  %2334 = vmatprep.subr.bf16.mxu1 %v3280_v32 }
  0x91   : > { %2110 = vmatpush2.bf16.msra.mxu0 %v3172_v42  ;;  %2335 = vmatpush2.bf16.msra.mxu1 %v3173_v43 }
  0x93   : > { %910 = vmatmul.mubr.bf16.gmra.mxu0 %v3136_v40  ;;  %1183 = vmatmul.mubr.bf16.gmra.mxu1 %v3136_v40 }
  0x94   : > { %919 = vmatprep.mubr.bf16.mxu0 %v3280_v32  ;;  %1192 = vmatprep.mubr.bf16.mxu1 %v3280_v32 }
  0x9b   : > { %920 = vmatmul.mubr.bf16.gmra.mxu0 %v3137_v41  ;;  %1193 = vmatmul.mubr.bf16.gmra.mxu1 %v3137_v41 }
  0x9c   : > { %929 = vmatprep.mubr.bf16.mxu0 %v3280_v32  ;;  %1202 = vmatprep.mubr.bf16.mxu1 %v3280_v32 }
  0xa3   : > { %930 = vmatmul.mubr.bf16.gmra.mxu0 %v3140_v44  ;;  %1203 = vmatmul.mubr.bf16.gmra.mxu1 %v3140_v44 }
  0xa4   : > { %939 = vmatprep.mubr.bf16.mxu0 %v3280_v32  ;;  %1212 = vmatprep.mubr.bf16.mxu1 %v3280_v32 }
  0xab   : > { %940 = vmatmul.mubr.bf16.gmra.mxu0 %v3143_v45  ;;  %1213 = vmatmul.mubr.bf16.gmra.mxu1 %v3143_v45 }
  0xac   : > { %949 = vmatprep.mubr.bf16.mxu0 %v3280_v32  ;;  %1222 = vmatprep.mubr.bf16.mxu1 %v3280_v32 }
  0xb3   : > { %950 = vmatmul.mubr.bf16.gmra.mxu0 %v3144_v46  ;;  %1223 = vmatmul.mubr.bf16.gmra.mxu1 %v3144_v46 }
  0xb4   : > { %959 = vmatprep.mubr.bf16.mxu0 %v3280_v32  ;;  %1232 = vmatprep.mubr.bf16.mxu1 %v3280_v32 }
  0xbb   : > { %960 = vmatmul.mubr.bf16.gmra.mxu0 %v3147_v47  ;;  %1233 = vmatmul.mubr.bf16.gmra.mxu1 %v3147_v47 }
  0xbc   : > { %969 = vmatprep.mubr.bf16.mxu0 %v3280_v32  ;;  %1242 = vmatprep.mubr.bf16.mxu1 %v3280_v32 }
  0xc3   : > { %970 = vmatmul.mubr.bf16.gmra.mxu0 %v3150_v48  ;;  %1243 = vmatmul.mubr.bf16.gmra.mxu1 %v3150_v48 }
  0xc4   : > { %979 = vmatprep.mubr.bf16.mxu0 %v3280_v32  ;;  %1252 = vmatprep.mubr.bf16.mxu1 %v3280_v32 }
  0xcb   : > { %980 = vmatmul.mubr.bf16.gmra.mxu0 %v3151_v49  ;;  %1253 = vmatmul.mubr.bf16.gmra.mxu1 %v3151_v49 }
  0xcc   : > { %989 = vmatprep.mubr.bf16.mxu0 %v3280_v32  ;;  %1262 = vmatprep.mubr.bf16.mxu1 %v3280_v32 }
  0xd3   : > { %990 = vmatmul.mubr.bf16.gmra.mxu0 %v3154_v50  ;;  %1263 = vmatmul.mubr.bf16.gmra.mxu1 %v3154_v50 }
  0xd4   : > { %999 = vmatprep.mubr.bf16.mxu0 %v3280_v32  ;;  %1272 = vmatprep.mubr.bf16.mxu1 %v3280_v32 }
  0xdb   : > { %1000 = vmatmul.mubr.bf16.gmra.mxu0 %v3157_v51  ;;  %1273 = vmatmul.mubr.bf16.gmra.mxu1 %v3157_v51 }
  0xdc   : > { %1009 = vmatprep.mubr.bf16.mxu0 %v3280_v32  ;;  %1282 = vmatprep.mubr.bf16.mxu1 %v3280_v32 }
  0xe3   : > { %1010 = vmatmul.mubr.bf16.gmra.mxu0 %v3158_v52  ;;  %1283 = vmatmul.mubr.bf16.gmra.mxu1 %v3158_v52 }
  0xe4   : > { %1019 = vmatprep.mubr.bf16.mxu0 %v3280_v32  ;;  %1292 = vmatprep.mubr.bf16.mxu1 %v3280_v32 }
  0xeb   : > { %1020 = vmatmul.mubr.bf16.gmra.mxu0 %v3161_v53  ;;  %1293 = vmatmul.mubr.bf16.gmra.mxu1 %v3161_v53 }
  0xec   : > { %1029 = vmatprep.mubr.bf16.mxu0 %v3280_v32  ;;  %1302 = vmatprep.mubr.bf16.mxu1 %v3280_v32 }
  0xf3   : > { %1030 = vmatmul.mubr.bf16.gmra.mxu0 %v3164_v54  ;;  %1303 = vmatmul.mubr.bf16.gmra.mxu1 %v3164_v54 }
  0xf4   : > { %1039 = vmatprep.mubr.bf16.mxu0 %v3280_v32  ;;  %1312 = vmatprep.mubr.bf16.mxu1 %v3280_v32 }
  0xfb   : > { %1040 = vmatmul.mubr.bf16.gmra.mxu0 %v3165_v55  ;;  %1313 = vmatmul.mubr.bf16.gmra.mxu1 %v3165_v55 }
  0xfc   : > { %1049 = vmatprep.mubr.bf16.mxu0 %v3280_v32  ;;  %1322 = vmatprep.mubr.bf16.mxu1 %v3280_v32 }
 0x103   : > { %1050 = vmatmul.mubr.bf16.gmra.mxu0 %v3168_v56  ;;  %1323 = vmatmul.mubr.bf16.gmra.mxu1 %v3168_v56 }
 0x104   : > { %1059 = vmatprep.mubr.bf16.mxu0 %v3280_v32  ;;  %1332 = vmatprep.mubr.bf16.mxu1 %v3280_v32  ;;  %v3688_v32 = vrot.slane %v471_v62, %v483_v61 }
 0x10b   : > { %1060 = vmatmul.mubr.bf16.gmra.mxu0 %v3171_v58  ;;  %1333 = vmatmul.mubr.bf16.gmra.mxu1 %v3171_v58 }
 0x113   : > { %v831_v4 = vpop.f32.mrf.mxu0  ;;  %v1104_v5 = vpop.f32.mrf.mxu1 }
 0x114   : > { %v832_v6 = vadd.f32 %v831_v4, %v3686_v1  ;;  %v1105_v7 = vadd.f32 %v1104_v5, %v3688_v32 }
 0x115   : > { %v833_v8 = vpop.f32.mrf.mxu0  ;;  %v1106_v9 = vpop.f32.mrf.mxu1 }
 0x116   : > { %v1343_v10 = vmax.f32 %v832_v6, 0.0  ;;  %v1345_v11 = vmax.f32 %v1105_v7, 0.0  ;;  %v834_v12 = vadd.f32 %v833_v8, %v3691_v2  ;;  %v1107_v13 = vadd.f32 %v1106_v9, %v3693_v3 }
 0x117   : > { %v835_v14 = vpop.f32.mrf.mxu0  ;;  %v1108_v15 = vpop.f32.mrf.mxu1 }
 0x118   : > { %1631 = vst [vmem:[%s3699_s11] sm:$0xff] %v1343_v10  ;;  %1633 = vst [vmem:[%s3699_s11 + $0x10] sm:$0xff] %v1345_v11  ;;  %v1344_v16 = vmax.f32 %v834_v12, 0.0  ;;  %v1346_v17 = vmax.f32 %v1107_v13, 0.0  ;;  %v836_v18 = vadd.f32 %v835_v14, %v3686_v1  ;;  %v1109_v19 = vadd.f32 %v1108_v15, %v3688_v32 }
 0x119   : > { %v837_v20 = vpop.f32.mrf.mxu0  ;;  %v1110_v21 = vpop.f32.mrf.mxu1 }
 0x11a   : > { %1632 = vst [vmem:[%s3699_s11 + $0x8] sm:$0xff] %v1344_v16  ;;  %1634 = vst [vmem:[%s3699_s11 + $0x18] sm:$0xff] %v1346_v17  ;;  %v1347_v22 = vmax.f32 %v836_v18, 0.0  ;;  %v1349_v23 = vmax.f32 %v1109_v19, 0.0  ;;  %v838_v24 = vadd.f32 %v837_v20, %v3691_v2  ;;  %v1111_v25 = vadd.f32 %v1110_v21, %v3693_v3 }
 0x11b   : > { %v841_v26 = vpop.f32.mrf.mxu0  ;;  %v1114_v27 = vpop.f32.mrf.mxu1 }
 0x11c   : > { %1635 = vst [vmem:[%s3699_s11 + $0x20] sm:$0xff] %v1347_v22  ;;  %1637 = vst [vmem:[%s3699_s11 + $0x30] sm:$0xff] %v1349_v23  ;;  %v1348_v28 = vmax.f32 %v838_v24, 0.0  ;;  %v1350_v29 = vmax.f32 %v1111_v25, 0.0  ;;  %v842_v30 = vadd.f32 %v841_v26, %v3686_v1  ;;  %v1115_v31 = vadd.f32 %v1114_v27, %v3688_v32 }
 0x11d   : > { %v843_v33 = vpop.f32.mrf.mxu0  ;;  %v1116_v34 = vpop.f32.mrf.mxu1  ;;  %v1535_v39 = vpack.c.bf16 %v1347_v22, %v1343_v10  ;;  %v1537_v40 = vpack.c.bf16 %v1349_v23, %v1345_v11 }
 0x11e   : > { %1636 = vst [vmem:[%s3699_s11 + $0x28] sm:$0xff] %v1348_v28  ;;  %1638 = vst [vmem:[%s3699_s11 + $0x38] sm:$0xff] %v1350_v29  ;;  %v844_v35 = vadd.f32 %v843_v33, %v3691_v2  ;;  %v1117_v36 = vadd.f32 %v1116_v34, %v3693_v3  ;;  %v1536_v37 = vpack.c.bf16 %v1348_v28, %v1344_v16  ;;  %v1351_v41 = vmax.f32 %v842_v30, 0.0 }
 0x11f   : > { %v1538_v38 = vpack.c.bf16 %v1350_v29, %v1346_v17  ;;  %v1353_v42 = vmax.f32 %v1115_v31, 0.0  ;;  %v845_v43 = vpop.f32.mrf.mxu0  ;;  %v1118_v44 = vpop.f32.mrf.mxu1 }
 0x120   : > { %v1352_v45 = vmax.f32 %v844_v35, 0.0  ;;  %v1354_v46 = vmax.f32 %v1117_v36, 0.0  ;;  %v846_v47 = vadd.f32 %v845_v43, %v3686_v1  ;;  %v1119_v48 = vadd.f32 %v1118_v44, %v3688_v32  ;;  %2111 = vmatprep.mubr.bf16.mxu0 %v1536_v37  ;;  %1639 = vst [vmem:[%s3699_s11 + $0x40] sm:$0xff] %v1351_v41 }
 0x121   : > { %2336 = vmatprep.mubr.bf16.mxu1 %v1538_v38  ;;  %1641 = vst [vmem:[%s3699_s11 + $0x50] sm:$0xff] %v1353_v42  ;;  %v847_v49 = vpop.f32.mrf.mxu0  ;;  %v1120_v50 = vpop.f32.mrf.mxu1  ;;  %2112 = vmatmul.mubr.bf16.vlgmr.msra.gmra.mxu0 %v1535_v39 }
 0x122   : > { %2337 = vmatmul.mubr.bf16.vlgmr.msra.gmra.mxu1 %v1537_v40  ;;  %1640 = vst [vmem:[%s3699_s11 + $0x48] sm:$0xff] %v1352_v45  ;;  %1642 = vst [vmem:[%s3699_s11 + $0x58] sm:$0xff] %v1354_v46  ;;  %v1355_v51 = vmax.f32 %v846_v47, 0.0  ;;  %v1357_v52 = vmax.f32 %v1119_v48, 0.0  ;;  %v848_v53 = vadd.f32 %v847_v49, %v3691_v2  ;;  %v1121_v54 = vadd.f32 %v1120_v50, %v3693_v3 }
 0x123   : > { %v851_v55 = vpop.f32.mrf.mxu0  ;;  %v1124_v56 = vpop.f32.mrf.mxu1 }
 0x124   : > { %1643 = vst [vmem:[%s3699_s11 + $0x60] sm:$0xff] %v1355_v51  ;;  %1645 = vst [vmem:[%s3699_s11 + $0x70] sm:$0xff] %v1357_v52  ;;  %v1356_v57 = vmax.f32 %v848_v53, 0.0  ;;  %v1358_v58 = vmax.f32 %v1121_v54, 0.0  ;;  %v852_v59 = vadd.f32 %v851_v55, %v3686_v1  ;;  %v1125_v60 = vadd.f32 %v1124_v56, %v3688_v32 }
 0x125   : > { %v853_v61 = vpop.f32.mrf.mxu0  ;;  %v1126_v62 = vpop.f32.mrf.mxu1  ;;  %v1539_v6 = vpack.c.bf16 %v1355_v51, %v1351_v41  ;;  %v1541_v7 = vpack.c.bf16 %v1357_v52, %v1353_v42 }
 0x126   : > { %1644 = vst [vmem:[%s3699_s11 + $0x68] sm:$0xff] %v1356_v57  ;;  %1646 = vst [vmem:[%s3699_s11 + $0x78] sm:$0xff] %v1358_v58  ;;  %v854_v63 = vadd.f32 %v853_v61, %v3691_v2  ;;  %v1127_v0 = vadd.f32 %v1126_v62, %v3693_v3  ;;  %v1540_v4 = vpack.c.bf16 %v1356_v57, %v1352_v45  ;;  %v1359_v8 = vmax.f32 %v852_v59, 0.0 }
 0x127   : > { %v1542_v5 = vpack.c.bf16 %v1358_v58, %v1354_v46  ;;  %v1361_v9 = vmax.f32 %v1125_v60, 0.0  ;;  %v855_v10 = vpop.f32.mrf.mxu0  ;;  %v1128_v11 = vpop.f32.mrf.mxu1 }
 0x128   : > { %v1360_v12 = vmax.f32 %v854_v63, 0.0  ;;  %v1362_v13 = vmax.f32 %v1127_v0, 0.0  ;;  %v856_v14 = vadd.f32 %v855_v10, %v3686_v1  ;;  %v1129_v15 = vadd.f32 %v1128_v11, %v3688_v32  ;;  %2119 = vmatprep.mubr.bf16.mxu0 %v1540_v4  ;;  %1647 = vst [vmem:[%s3699_s11 + $0x80] sm:$0xff] %v1359_v8 }
 0x129   : > { %2344 = vmatprep.mubr.bf16.mxu1 %v1542_v5  ;;  %1649 = vst [vmem:[%s3699_s11 + $0x90] sm:$0xff] %v1361_v9  ;;  %v857_v16 = vpop.f32.mrf.mxu0  ;;  %v1130_v17 = vpop.f32.mrf.mxu1  ;;  %2120 = vmatmul.mubr.bf16.gmra.mxu0 %v1539_v6 }
 0x12a   : > { %2345 = vmatmul.mubr.bf16.gmra.mxu1 %v1541_v7  ;;  %1648 = vst [vmem:[%s3699_s11 + $0x88] sm:$0xff] %v1360_v12  ;;  %1650 = vst [vmem:[%s3699_s11 + $0x98] sm:$0xff] %v1362_v13  ;;  %v1363_v18 = vmax.f32 %v856_v14, 0.0  ;;  %v1365_v19 = vmax.f32 %v1129_v15, 0.0  ;;  %v858_v20 = vadd.f32 %v857_v16, %v3691_v2  ;;  %v1131_v21 = vadd.f32 %v1130_v17, %v3693_v3 }
 0x12b   : > { %v861_v22 = vpop.f32.mrf.mxu0  ;;  %v1134_v23 = vpop.f32.mrf.mxu1 }
 0x12c   : > { %1651 = vst [vmem:[%s3699_s11 + $0xa0] sm:$0xff] %v1363_v18  ;;  %1653 = vst [vmem:[%s3699_s11 + $0xb0] sm:$0xff] %v1365_v19  ;;  %v1364_v24 = vmax.f32 %v858_v20, 0.0  ;;  %v1366_v25 = vmax.f32 %v1131_v21, 0.0  ;;  %v862_v26 = vadd.f32 %v861_v22, %v3686_v1  ;;  %v1135_v27 = vadd.f32 %v1134_v23, %v3688_v32 }
 0x12d   : > { %v863_v28 = vpop.f32.mrf.mxu0  ;;  %v1136_v29 = vpop.f32.mrf.mxu1  ;;  %v1543_v35 = vpack.c.bf16 %v1363_v18, %v1359_v8  ;;  %v1545_v36 = vpack.c.bf16 %v1365_v19, %v1361_v9 }
 0x12e   : > { %1652 = vst [vmem:[%s3699_s11 + $0xa8] sm:$0xff] %v1364_v24  ;;  %1654 = vst [vmem:[%s3699_s11 + $0xb8] sm:$0xff] %v1366_v25  ;;  %v864_v30 = vadd.f32 %v863_v28, %v3691_v2  ;;  %v1137_v31 = vadd.f32 %v1136_v29, %v3693_v3  ;;  %v1544_v33 = vpack.c.bf16 %v1364_v24, %v1360_v12  ;;  %v1367_v37 = vmax.f32 %v862_v26, 0.0 }
 0x12f   : > { %v1546_v34 = vpack.c.bf16 %v1366_v25, %v1362_v13  ;;  %v1369_v38 = vmax.f32 %v1135_v27, 0.0  ;;  %v865_v39 = vpop.f32.mrf.mxu0  ;;  %v1138_v40 = vpop.f32.mrf.mxu1 }
 0x130   : > { %v1368_v41 = vmax.f32 %v864_v30, 0.0  ;;  %v1370_v42 = vmax.f32 %v1137_v31, 0.0  ;;  %v866_v43 = vadd.f32 %v865_v39, %v3686_v1  ;;  %v1139_v44 = vadd.f32 %v1138_v40, %v3688_v32  ;;  %2127 = vmatprep.mubr.bf16.mxu0 %v1544_v33  ;;  %1655 = vst [vmem:[%s3699_s11 + $0xc0] sm:$0xff] %v1367_v37 }
 0x131   : > { %2352 = vmatprep.mubr.bf16.mxu1 %v1546_v34  ;;  %1657 = vst [vmem:[%s3699_s11 + $0xd0] sm:$0xff] %v1369_v38  ;;  %v867_v45 = vpop.f32.mrf.mxu0  ;;  %v1140_v46 = vpop.f32.mrf.mxu1  ;;  %2128 = vmatmul.mubr.bf16.gmra.mxu0 %v1543_v35 }
 0x132   : > { %2353 = vmatmul.mubr.bf16.gmra.mxu1 %v1545_v36  ;;  %1656 = vst [vmem:[%s3699_s11 + $0xc8] sm:$0xff] %v1368_v41  ;;  %1658 = vst [vmem:[%s3699_s11 + $0xd8] sm:$0xff] %v1370_v42  ;;  %v1371_v47 = vmax.f32 %v866_v43, 0.0  ;;  %v1373_v48 = vmax.f32 %v1139_v44, 0.0  ;;  %v868_v49 = vadd.f32 %v867_v45, %v3691_v2  ;;  %v1141_v50 = vadd.f32 %v1140_v46, %v3693_v3 }
 0x133   : > { %v871_v51 = vpop.f32.mrf.mxu0  ;;  %v1144_v52 = vpop.f32.mrf.mxu1 }
 0x134   : > { %1659 = vst [vmem:[%s3699_s11 + $0xe0] sm:$0xff] %v1371_v47  ;;  %1661 = vst [vmem:[%s3699_s11 + $0xf0] sm:$0xff] %v1373_v48  ;;  %v1372_v53 = vmax.f32 %v868_v49, 0.0  ;;  %v1374_v54 = vmax.f32 %v1141_v50, 0.0  ;;  %v872_v55 = vadd.f32 %v871_v51, %v3686_v1  ;;  %v1145_v56 = vadd.f32 %v1144_v52, %v3688_v32 }
 0x135   : > { %v873_v57 = vpop.f32.mrf.mxu0  ;;  %v1146_v58 = vpop.f32.mrf.mxu1  ;;  %v1547_v63 = vpack.c.bf16 %v1371_v47, %v1367_v37  ;;  %v1549_v0 = vpack.c.bf16 %v1373_v48, %v1369_v38 }
 0x136   : > { %1660 = vst [vmem:[%s3699_s11 + $0xe8] sm:$0xff] %v1372_v53  ;;  %1662 = vst [vmem:[%s3699_s11 + $0xf8] sm:$0xff] %v1374_v54  ;;  %v874_v59 = vadd.f32 %v873_v57, %v3691_v2  ;;  %v1147_v60 = vadd.f32 %v1146_v58, %v3693_v3  ;;  %v1548_v61 = vpack.c.bf16 %v1372_v53, %v1368_v41  ;;  %v1375_v4 = vmax.f32 %v872_v55, 0.0 }
 0x137   : > { %v1550_v62 = vpack.c.bf16 %v1374_v54, %v1370_v42  ;;  %v1377_v5 = vmax.f32 %v1145_v56, 0.0  ;;  %v875_v6 = vpop.f32.mrf.mxu0  ;;  %v1148_v7 = vpop.f32.mrf.mxu1 }
 0x138   : > { %v1376_v8 = vmax.f32 %v874_v59, 0.0  ;;  %v1378_v9 = vmax.f32 %v1147_v60, 0.0  ;;  %v876_v10 = vadd.f32 %v875_v6, %v3686_v1  ;;  %v1149_v11 = vadd.f32 %v1148_v7, %v3688_v32  ;;  %2135 = vmatprep.mubr.bf16.mxu0 %v1548_v61  ;;  %1663 = vst [vmem:[%s3699_s11 + $0x100] sm:$0xff] %v1375_v4 }
 0x139   : > { %2360 = vmatprep.mubr.bf16.mxu1 %v1550_v62  ;;  %1665 = vst [vmem:[%s3699_s11 + $0x110] sm:$0xff] %v1377_v5  ;;  %v877_v12 = vpop.f32.mrf.mxu0  ;;  %v1150_v13 = vpop.f32.mrf.mxu1  ;;  %2136 = vmatmul.mubr.bf16.gmra.mxu0 %v1547_v63 }
 0x13a   : > { %2361 = vmatmul.mubr.bf16.gmra.mxu1 %v1549_v0  ;;  %1664 = vst [vmem:[%s3699_s11 + $0x108] sm:$0xff] %v1376_v8  ;;  %1666 = vst [vmem:[%s3699_s11 + $0x118] sm:$0xff] %v1378_v9  ;;  %v1379_v14 = vmax.f32 %v876_v10, 0.0  ;;  %v1381_v15 = vmax.f32 %v1149_v11, 0.0  ;;  %v878_v16 = vadd.f32 %v877_v12, %v3691_v2  ;;  %v1151_v17 = vadd.f32 %v1150_v13, %v3693_v3 }
 0x13b   : > { %v881_v18 = vpop.f32.mrf.mxu0  ;;  %v1154_v19 = vpop.f32.mrf.mxu1 }
 0x13c   : > { %1667 = vst [vmem:[%s3699_s11 + $0x120] sm:$0xff] %v1379_v14  ;;  %1669 = vst [vmem:[%s3699_s11 + $0x130] sm:$0xff] %v1381_v15  ;;  %v1380_v20 = vmax.f32 %v878_v16, 0.0  ;;  %v1382_v21 = vmax.f32 %v1151_v17, 0.0  ;;  %v882_v22 = vadd.f32 %v881_v18, %v3686_v1  ;;  %v1155_v23 = vadd.f32 %v1154_v19, %v3688_v32 }
 0x13d   : > { %v883_v24 = vpop.f32.mrf.mxu0  ;;  %v1156_v25 = vpop.f32.mrf.mxu1  ;;  %v1551_v30 = vpack.c.bf16 %v1379_v14, %v1375_v4  ;;  %v1553_v31 = vpack.c.bf16 %v1381_v15, %v1377_v5 }
 0x13e   : > { %1668 = vst [vmem:[%s3699_s11 + $0x128] sm:$0xff] %v1380_v20  ;;  %1670 = vst [vmem:[%s3699_s11 + $0x138] sm:$0xff] %v1382_v21  ;;  %v884_v26 = vadd.f32 %v883_v24, %v3691_v2  ;;  %v1157_v27 = vadd.f32 %v1156_v25, %v3693_v3  ;;  %v1552_v28 = vpack.c.bf16 %v1380_v20, %v1376_v8  ;;  %v1383_v33 = vmax.f32 %v882_v22, 0.0 }
 0x13f   : > { %v1554_v29 = vpack.c.bf16 %v1382_v21, %v1378_v9  ;;  %v1385_v34 = vmax.f32 %v1155_v23, 0.0  ;;  %v885_v35 = vpop.f32.mrf.mxu0  ;;  %v1158_v36 = vpop.f32.mrf.mxu1 }
 0x140   : > { %v1384_v37 = vmax.f32 %v884_v26, 0.0  ;;  %v1386_v38 = vmax.f32 %v1157_v27, 0.0  ;;  %v886_v39 = vadd.f32 %v885_v35, %v3686_v1  ;;  %v1159_v40 = vadd.f32 %v1158_v36, %v3688_v32  ;;  %2143 = vmatprep.mubr.bf16.mxu0 %v1552_v28  ;;  %1671 = vst [vmem:[%s3699_s11 + $0x140] sm:$0xff] %v1383_v33 }
 0x141   : > { %2368 = vmatprep.mubr.bf16.mxu1 %v1554_v29  ;;  %1673 = vst [vmem:[%s3699_s11 + $0x150] sm:$0xff] %v1385_v34  ;;  %v887_v41 = vpop.f32.mrf.mxu0  ;;  %v1160_v42 = vpop.f32.mrf.mxu1  ;;  %2144 = vmatmul.mubr.bf16.gmra.mxu0 %v1551_v30 }
 0x142   : > { %2369 = vmatmul.mubr.bf16.gmra.mxu1 %v1553_v31  ;;  %1672 = vst [vmem:[%s3699_s11 + $0x148] sm:$0xff] %v1384_v37  ;;  %1674 = vst [vmem:[%s3699_s11 + $0x158] sm:$0xff] %v1386_v38  ;;  %v1387_v43 = vmax.f32 %v886_v39, 0.0  ;;  %v1389_v44 = vmax.f32 %v1159_v40, 0.0  ;;  %v888_v45 = vadd.f32 %v887_v41, %v3691_v2  ;;  %v1161_v46 = vadd.f32 %v1160_v42, %v3693_v3 }
 0x143   : > { %v891_v47 = vpop.f32.mrf.mxu0  ;;  %v1164_v48 = vpop.f32.mrf.mxu1 }
 0x144   : > { %1675 = vst [vmem:[%s3699_s11 + $0x160] sm:$0xff] %v1387_v43  ;;  %1677 = vst [vmem:[%s3699_s11 + $0x170] sm:$0xff] %v1389_v44  ;;  %v1388_v49 = vmax.f32 %v888_v45, 0.0  ;;  %v1390_v50 = vmax.f32 %v1161_v46, 0.0  ;;  %v892_v51 = vadd.f32 %v891_v47, %v3686_v1  ;;  %v1165_v52 = vadd.f32 %v1164_v48, %v3688_v32 }
 0x145   : > { %v893_v53 = vpop.f32.mrf.mxu0  ;;  %v1166_v54 = vpop.f32.mrf.mxu1  ;;  %v1555_v59 = vpack.c.bf16 %v1387_v43, %v1383_v33  ;;  %v1557_v60 = vpack.c.bf16 %v1389_v44, %v1385_v34 }
 0x146   : > { %1676 = vst [vmem:[%s3699_s11 + $0x168] sm:$0xff] %v1388_v49  ;;  %1678 = vst [vmem:[%s3699_s11 + $0x178] sm:$0xff] %v1390_v50  ;;  %v894_v55 = vadd.f32 %v893_v53, %v3691_v2  ;;  %v1167_v56 = vadd.f32 %v1166_v54, %v3693_v3  ;;  %v1556_v57 = vpack.c.bf16 %v1388_v49, %v1384_v37  ;;  %v1391_v61 = vmax.f32 %v892_v51, 0.0 }
 0x147   : > { %v1558_v58 = vpack.c.bf16 %v1390_v50, %v1386_v38  ;;  %v1393_v62 = vmax.f32 %v1165_v52, 0.0  ;;  %v895_v63 = vpop.f32.mrf.mxu0  ;;  %v1168_v0 = vpop.f32.mrf.mxu1 }
 0x148   : > { %v1392_v4 = vmax.f32 %v894_v55, 0.0  ;;  %v1394_v5 = vmax.f32 %v1167_v56, 0.0  ;;  %v896_v6 = vadd.f32 %v895_v63, %v3686_v1  ;;  %v1169_v7 = vadd.f32 %v1168_v0, %v3688_v32  ;;  %2151 = vmatprep.mubr.bf16.mxu0 %v1556_v57  ;;  %1679 = vst [vmem:[%s3699_s11 + $0x180] sm:$0xff] %v1391_v61 }
 0x149   : > { %2376 = vmatprep.mubr.bf16.mxu1 %v1558_v58  ;;  %1681 = vst [vmem:[%s3699_s11 + $0x190] sm:$0xff] %v1393_v62  ;;  %v897_v8 = vpop.f32.mrf.mxu0  ;;  %v1170_v9 = vpop.f32.mrf.mxu1  ;;  %2152 = vmatmul.mubr.bf16.gmra.mxu0 %v1555_v59 }
 0x14a   : > { %2377 = vmatmul.mubr.bf16.gmra.mxu1 %v1557_v60  ;;  %1680 = vst [vmem:[%s3699_s11 + $0x188] sm:$0xff] %v1392_v4  ;;  %1682 = vst [vmem:[%s3699_s11 + $0x198] sm:$0xff] %v1394_v5  ;;  %v1395_v10 = vmax.f32 %v896_v6, 0.0  ;;  %v1397_v11 = vmax.f32 %v1169_v7, 0.0  ;;  %v898_v12 = vadd.f32 %v897_v8, %v3691_v2  ;;  %v1171_v13 = vadd.f32 %v1170_v9, %v3693_v3 }
 0x14b   : > { %v901_v14 = vpop.f32.mrf.mxu0  ;;  %v1174_v15 = vpop.f32.mrf.mxu1 }
 0x14c   : > { %1683 = vst [vmem:[%s3699_s11 + $0x1a0] sm:$0xff] %v1395_v10  ;;  %1685 = vst [vmem:[%s3699_s11 + $0x1b0] sm:$0xff] %v1397_v11  ;;  %v1396_v16 = vmax.f32 %v898_v12, 0.0  ;;  %v1398_v17 = vmax.f32 %v1171_v13, 0.0  ;;  %v902_v18 = vadd.f32 %v901_v14, %v3686_v1  ;;  %v1175_v19 = vadd.f32 %v1174_v15, %v3688_v32 }
 0x14d   : > { %v903_v20 = vpop.f32.mrf.mxu0  ;;  %v1176_v21 = vpop.f32.mrf.mxu1  ;;  %v1559_v26 = vpack.c.bf16 %v1395_v10, %v1391_v61  ;;  %v1561_v27 = vpack.c.bf16 %v1397_v11, %v1393_v62 }
 0x14e   : > { %1684 = vst [vmem:[%s3699_s11 + $0x1a8] sm:$0xff] %v1396_v16  ;;  %1686 = vst [vmem:[%s3699_s11 + $0x1b8] sm:$0xff] %v1398_v17  ;;  %v904_v22 = vadd.f32 %v903_v20, %v3691_v2  ;;  %v1177_v23 = vadd.f32 %v1176_v21, %v3693_v3  ;;  %v1560_v24 = vpack.c.bf16 %v1396_v16, %v1392_v4  ;;  %v1399_v28 = vmax.f32 %v902_v18, 0.0 }
 0x14f   : > { %v1562_v25 = vpack.c.bf16 %v1398_v17, %v1394_v5  ;;  %v1401_v29 = vmax.f32 %v1175_v19, 0.0  ;;  %v905_v30 = vpop.f32.mrf.mxu0  ;;  %v1178_v31 = vpop.f32.mrf.mxu1 }
 0x150   : > { %v1400_v33 = vmax.f32 %v904_v22, 0.0  ;;  %v1402_v34 = vmax.f32 %v1177_v23, 0.0  ;;  %v906_v35 = vadd.f32 %v905_v30, %v3686_v1  ;;  %v1179_v36 = vadd.f32 %v1178_v31, %v3688_v32  ;;  %2159 = vmatprep.mubr.bf16.mxu0 %v1560_v24  ;;  %1687 = vst [vmem:[%s3699_s11 + $0x1c0] sm:$0xff] %v1399_v28 }
 0x151   : > { %2384 = vmatprep.mubr.bf16.mxu1 %v1562_v25  ;;  %1689 = vst [vmem:[%s3699_s11 + $0x1d0] sm:$0xff] %v1401_v29  ;;  %v907_v37 = vpop.f32.mrf.mxu0  ;;  %v1180_v38 = vpop.f32.mrf.mxu1  ;;  %2160 = vmatmul.mubr.bf16.gmra.mxu0 %v1559_v26 }
 0x152   : > { %2385 = vmatmul.mubr.bf16.gmra.mxu1 %v1561_v27  ;;  %1688 = vst [vmem:[%s3699_s11 + $0x1c8] sm:$0xff] %v1400_v33  ;;  %1690 = vst [vmem:[%s3699_s11 + $0x1d8] sm:$0xff] %v1402_v34  ;;  %v1403_v39 = vmax.f32 %v906_v35, 0.0  ;;  %v1405_v40 = vmax.f32 %v1179_v36, 0.0  ;;  %v908_v41 = vadd.f32 %v907_v37, %v3691_v2  ;;  %v1181_v42 = vadd.f32 %v1180_v38, %v3693_v3 }
 0x153   : > { %v911_v43 = vpop.f32.mrf.mxu0  ;;  %v1184_v44 = vpop.f32.mrf.mxu1 }
 0x154   : > { %1691 = vst [vmem:[%s3699_s11 + $0x1e0] sm:$0xff] %v1403_v39  ;;  %1693 = vst [vmem:[%s3699_s11 + $0x1f0] sm:$0xff] %v1405_v40  ;;  %v1404_v45 = vmax.f32 %v908_v41, 0.0  ;;  %v1406_v46 = vmax.f32 %v1181_v42, 0.0  ;;  %v912_v47 = vadd.f32 %v911_v43, %v3686_v1  ;;  %v1185_v48 = vadd.f32 %v1184_v44, %v3688_v32 }
 0x155   : > { %v913_v49 = vpop.f32.mrf.mxu0  ;;  %v1186_v50 = vpop.f32.mrf.mxu1  ;;  %v1563_v55 = vpack.c.bf16 %v1403_v39, %v1399_v28  ;;  %v1565_v56 = vpack.c.bf16 %v1405_v40, %v1401_v29 }
 0x156   : > { %1692 = vst [vmem:[%s3699_s11 + $0x1e8] sm:$0xff] %v1404_v45  ;;  %1694 = vst [vmem:[%s3699_s11 + $0x1f8] sm:$0xff] %v1406_v46  ;;  %v914_v51 = vadd.f32 %v913_v49, %v3691_v2  ;;  %v1187_v52 = vadd.f32 %v1186_v50, %v3693_v3  ;;  %v1564_v53 = vpack.c.bf16 %v1404_v45, %v1400_v33  ;;  %v1407_v57 = vmax.f32 %v912_v47, 0.0 }
 0x157   : > { %v1566_v54 = vpack.c.bf16 %v1406_v46, %v1402_v34  ;;  %v1409_v58 = vmax.f32 %v1185_v48, 0.0  ;;  %v915_v59 = vpop.f32.mrf.mxu0  ;;  %v1188_v60 = vpop.f32.mrf.mxu1 }
 0x158   : > { %v1408_v61 = vmax.f32 %v914_v51, 0.0  ;;  %v1410_v62 = vmax.f32 %v1187_v52, 0.0  ;;  %v916_v63 = vadd.f32 %v915_v59, %v3686_v1  ;;  %v1189_v0 = vadd.f32 %v1188_v60, %v3688_v32  ;;  %2167 = vmatprep.mubr.bf16.mxu0 %v1564_v53  ;;  %1695 = vst [vmem:[%s3699_s11 + $0x200] sm:$0xff] %v1407_v57 }
 0x159   : > { %2392 = vmatprep.mubr.bf16.mxu1 %v1566_v54  ;;  %1697 = vst [vmem:[%s3699_s11 + $0x210] sm:$0xff] %v1409_v58  ;;  %v917_v4 = vpop.f32.mrf.mxu0  ;;  %v1190_v5 = vpop.f32.mrf.mxu1  ;;  %2168 = vmatmul.mubr.bf16.gmra.mxu0 %v1563_v55 }
 0x15a   : > { %2393 = vmatmul.mubr.bf16.gmra.mxu1 %v1565_v56  ;;  %1696 = vst [vmem:[%s3699_s11 + $0x208] sm:$0xff] %v1408_v61  ;;  %1698 = vst [vmem:[%s3699_s11 + $0x218] sm:$0xff] %v1410_v62  ;;  %v1411_v6 = vmax.f32 %v916_v63, 0.0  ;;  %v1413_v7 = vmax.f32 %v1189_v0, 0.0  ;;  %v918_v8 = vadd.f32 %v917_v4, %v3691_v2  ;;  %v1191_v9 = vadd.f32 %v1190_v5, %v3693_v3 }
 0x15b   : > { %v921_v10 = vpop.f32.mrf.mxu0  ;;  %v1194_v11 = vpop.f32.mrf.mxu1 }
 0x15c   : > { %1699 = vst [vmem:[%s3699_s11 + $0x220] sm:$0xff] %v1411_v6  ;;  %1701 = vst [vmem:[%s3699_s11 + $0x230] sm:$0xff] %v1413_v7  ;;  %v1412_v12 = vmax.f32 %v918_v8, 0.0  ;;  %v1414_v13 = vmax.f32 %v1191_v9, 0.0  ;;  %v922_v14 = vadd.f32 %v921_v10, %v3686_v1  ;;  %v1195_v15 = vadd.f32 %v1194_v11, %v3688_v32 }
 0x15d   : > { %v923_v16 = vpop.f32.mrf.mxu0  ;;  %v1196_v17 = vpop.f32.mrf.mxu1  ;;  %v1567_v22 = vpack.c.bf16 %v1411_v6, %v1407_v57  ;;  %v1569_v23 = vpack.c.bf16 %v1413_v7, %v1409_v58 }
 0x15e   : > { %1700 = vst [vmem:[%s3699_s11 + $0x228] sm:$0xff] %v1412_v12  ;;  %1702 = vst [vmem:[%s3699_s11 + $0x238] sm:$0xff] %v1414_v13  ;;  %v924_v18 = vadd.f32 %v923_v16, %v3691_v2  ;;  %v1197_v19 = vadd.f32 %v1196_v17, %v3693_v3  ;;  %v1568_v20 = vpack.c.bf16 %v1412_v12, %v1408_v61  ;;  %v1415_v24 = vmax.f32 %v922_v14, 0.0 }
 0x15f   : > { %v1570_v21 = vpack.c.bf16 %v1414_v13, %v1410_v62  ;;  %v1417_v25 = vmax.f32 %v1195_v15, 0.0  ;;  %v925_v26 = vpop.f32.mrf.mxu0  ;;  %v1198_v27 = vpop.f32.mrf.mxu1 }
 0x160   : > { %v1416_v28 = vmax.f32 %v924_v18, 0.0  ;;  %v1418_v29 = vmax.f32 %v1197_v19, 0.0  ;;  %v926_v30 = vadd.f32 %v925_v26, %v3686_v1  ;;  %v1199_v31 = vadd.f32 %v1198_v27, %v3688_v32  ;;  %2175 = vmatprep.mubr.bf16.mxu0 %v1568_v20  ;;  %1703 = vst [vmem:[%s3699_s11 + $0x240] sm:$0xff] %v1415_v24 }
 0x161   : > { %2400 = vmatprep.mubr.bf16.mxu1 %v1570_v21  ;;  %1705 = vst [vmem:[%s3699_s11 + $0x250] sm:$0xff] %v1417_v25  ;;  %v927_v33 = vpop.f32.mrf.mxu0  ;;  %v1200_v34 = vpop.f32.mrf.mxu1  ;;  %2176 = vmatmul.mubr.bf16.gmra.mxu0 %v1567_v22 }
 0x162   : > { %2401 = vmatmul.mubr.bf16.gmra.mxu1 %v1569_v23  ;;  %1704 = vst [vmem:[%s3699_s11 + $0x248] sm:$0xff] %v1416_v28  ;;  %1706 = vst [vmem:[%s3699_s11 + $0x258] sm:$0xff] %v1418_v29  ;;  %v1419_v35 = vmax.f32 %v926_v30, 0.0  ;;  %v1421_v36 = vmax.f32 %v1199_v31, 0.0  ;;  %v928_v37 = vadd.f32 %v927_v33, %v3691_v2  ;;  %v1201_v38 = vadd.f32 %v1200_v34, %v3693_v3 }
 0x163   : > { %v931_v39 = vpop.f32.mrf.mxu0  ;;  %v1204_v40 = vpop.f32.mrf.mxu1 }
 0x164   : > { %1707 = vst [vmem:[%s3699_s11 + $0x260] sm:$0xff] %v1419_v35  ;;  %1709 = vst [vmem:[%s3699_s11 + $0x270] sm:$0xff] %v1421_v36  ;;  %v1420_v41 = vmax.f32 %v928_v37, 0.0  ;;  %v1422_v42 = vmax.f32 %v1201_v38, 0.0  ;;  %v932_v43 = vadd.f32 %v931_v39, %v3686_v1  ;;  %v1205_v44 = vadd.f32 %v1204_v40, %v3688_v32 }
 0x165   : > { %v933_v45 = vpop.f32.mrf.mxu0  ;;  %v1206_v46 = vpop.f32.mrf.mxu1  ;;  %v1571_v51 = vpack.c.bf16 %v1419_v35, %v1415_v24  ;;  %v1573_v52 = vpack.c.bf16 %v1421_v36, %v1417_v25 }
 0x166   : > { %1708 = vst [vmem:[%s3699_s11 + $0x268] sm:$0xff] %v1420_v41  ;;  %1710 = vst [vmem:[%s3699_s11 + $0x278] sm:$0xff] %v1422_v42  ;;  %v934_v47 = vadd.f32 %v933_v45, %v3691_v2  ;;  %v1207_v48 = vadd.f32 %v1206_v46, %v3693_v3  ;;  %v1572_v49 = vpack.c.bf16 %v1420_v41, %v1416_v28  ;;  %v1423_v53 = vmax.f32 %v932_v43, 0.0 }
 0x167   : > { %v1574_v50 = vpack.c.bf16 %v1422_v42, %v1418_v29  ;;  %v1425_v54 = vmax.f32 %v1205_v44, 0.0  ;;  %v935_v55 = vpop.f32.mrf.mxu0  ;;  %v1208_v56 = vpop.f32.mrf.mxu1 }
 0x168   : > { %v1424_v57 = vmax.f32 %v934_v47, 0.0  ;;  %v1426_v58 = vmax.f32 %v1207_v48, 0.0  ;;  %v936_v59 = vadd.f32 %v935_v55, %v3686_v1  ;;  %v1209_v60 = vadd.f32 %v1208_v56, %v3688_v32  ;;  %2183 = vmatprep.mubr.bf16.mxu0 %v1572_v49  ;;  %1711 = vst [vmem:[%s3699_s11 + $0x280] sm:$0xff] %v1423_v53 }
 0x169   : > { %2408 = vmatprep.mubr.bf16.mxu1 %v1574_v50  ;;  %1713 = vst [vmem:[%s3699_s11 + $0x290] sm:$0xff] %v1425_v54  ;;  %v937_v61 = vpop.f32.mrf.mxu0  ;;  %v1210_v62 = vpop.f32.mrf.mxu1  ;;  %2184 = vmatmul.mubr.bf16.gmra.mxu0 %v1571_v51 }
 0x16a   : > { %2409 = vmatmul.mubr.bf16.gmra.mxu1 %v1573_v52  ;;  %1712 = vst [vmem:[%s3699_s11 + $0x288] sm:$0xff] %v1424_v57  ;;  %1714 = vst [vmem:[%s3699_s11 + $0x298] sm:$0xff] %v1426_v58  ;;  %v1427_v63 = vmax.f32 %v936_v59, 0.0  ;;  %v1429_v0 = vmax.f32 %v1209_v60, 0.0  ;;  %v938_v4 = vadd.f32 %v937_v61, %v3691_v2  ;;  %v1211_v5 = vadd.f32 %v1210_v62, %v3693_v3 }
 0x16b   : > { %v941_v6 = vpop.f32.mrf.mxu0  ;;  %v1214_v7 = vpop.f32.mrf.mxu1 }
 0x16c   : > { %1715 = vst [vmem:[%s3699_s11 + $0x2a0] sm:$0xff] %v1427_v63  ;;  %1717 = vst [vmem:[%s3699_s11 + $0x2b0] sm:$0xff] %v1429_v0  ;;  %v1428_v8 = vmax.f32 %v938_v4, 0.0  ;;  %v1430_v9 = vmax.f32 %v1211_v5, 0.0  ;;  %v942_v10 = vadd.f32 %v941_v6, %v3686_v1  ;;  %v1215_v11 = vadd.f32 %v1214_v7, %v3688_v32 }
 0x16d   : > { %v943_v12 = vpop.f32.mrf.mxu0  ;;  %v1216_v13 = vpop.f32.mrf.mxu1  ;;  %v1575_v18 = vpack.c.bf16 %v1427_v63, %v1423_v53  ;;  %v1577_v19 = vpack.c.bf16 %v1429_v0, %v1425_v54 }
 0x16e   : > { %1716 = vst [vmem:[%s3699_s11 + $0x2a8] sm:$0xff] %v1428_v8  ;;  %1718 = vst [vmem:[%s3699_s11 + $0x2b8] sm:$0xff] %v1430_v9  ;;  %v944_v14 = vadd.f32 %v943_v12, %v3691_v2  ;;  %v1217_v15 = vadd.f32 %v1216_v13, %v3693_v3  ;;  %v1576_v16 = vpack.c.bf16 %v1428_v8, %v1424_v57  ;;  %v1431_v20 = vmax.f32 %v942_v10, 0.0 }
 0x16f   : > { %v1578_v17 = vpack.c.bf16 %v1430_v9, %v1426_v58  ;;  %v1433_v21 = vmax.f32 %v1215_v11, 0.0  ;;  %v945_v22 = vpop.f32.mrf.mxu0  ;;  %v1218_v23 = vpop.f32.mrf.mxu1 }
 0x170   : > { %v1432_v24 = vmax.f32 %v944_v14, 0.0  ;;  %v1434_v25 = vmax.f32 %v1217_v15, 0.0  ;;  %v946_v26 = vadd.f32 %v945_v22, %v3686_v1  ;;  %v1219_v27 = vadd.f32 %v1218_v23, %v3688_v32  ;;  %2191 = vmatprep.mubr.bf16.mxu0 %v1576_v16  ;;  %1719 = vst [vmem:[%s3699_s11 + $0x2c0] sm:$0xff] %v1431_v20 }
 0x171   : > { %2416 = vmatprep.mubr.bf16.mxu1 %v1578_v17  ;;  %1721 = vst [vmem:[%s3699_s11 + $0x2d0] sm:$0xff] %v1433_v21  ;;  %v947_v28 = vpop.f32.mrf.mxu0  ;;  %v1220_v29 = vpop.f32.mrf.mxu1  ;;  %2192 = vmatmul.mubr.bf16.gmra.mxu0 %v1575_v18 }
 0x172   : > { %2417 = vmatmul.mubr.bf16.gmra.mxu1 %v1577_v19  ;;  %1720 = vst [vmem:[%s3699_s11 + $0x2c8] sm:$0xff] %v1432_v24  ;;  %1722 = vst [vmem:[%s3699_s11 + $0x2d8] sm:$0xff] %v1434_v25  ;;  %v1435_v30 = vmax.f32 %v946_v26, 0.0  ;;  %v1437_v31 = vmax.f32 %v1219_v27, 0.0  ;;  %v948_v33 = vadd.f32 %v947_v28, %v3691_v2  ;;  %v1221_v34 = vadd.f32 %v1220_v29, %v3693_v3 }
 0x173   : > { %v951_v35 = vpop.f32.mrf.mxu0  ;;  %v1224_v36 = vpop.f32.mrf.mxu1 }
 0x174   : > { %1723 = vst [vmem:[%s3699_s11 + $0x2e0] sm:$0xff] %v1435_v30  ;;  %1725 = vst [vmem:[%s3699_s11 + $0x2f0] sm:$0xff] %v1437_v31  ;;  %v1436_v37 = vmax.f32 %v948_v33, 0.0  ;;  %v1438_v38 = vmax.f32 %v1221_v34, 0.0  ;;  %v952_v39 = vadd.f32 %v951_v35, %v3686_v1  ;;  %v1225_v40 = vadd.f32 %v1224_v36, %v3688_v32 }
 0x175   : > { %v953_v41 = vpop.f32.mrf.mxu0  ;;  %v1226_v42 = vpop.f32.mrf.mxu1  ;;  %v1579_v47 = vpack.c.bf16 %v1435_v30, %v1431_v20  ;;  %v1581_v48 = vpack.c.bf16 %v1437_v31, %v1433_v21 }
 0x176   : > { %1724 = vst [vmem:[%s3699_s11 + $0x2e8] sm:$0xff] %v1436_v37  ;;  %1726 = vst [vmem:[%s3699_s11 + $0x2f8] sm:$0xff] %v1438_v38  ;;  %v954_v43 = vadd.f32 %v953_v41, %v3691_v2  ;;  %v1227_v44 = vadd.f32 %v1226_v42, %v3693_v3  ;;  %v1580_v45 = vpack.c.bf16 %v1436_v37, %v1432_v24  ;;  %v1439_v49 = vmax.f32 %v952_v39, 0.0 }
 0x177   : > { %v1582_v46 = vpack.c.bf16 %v1438_v38, %v1434_v25  ;;  %v1441_v50 = vmax.f32 %v1225_v40, 0.0  ;;  %v955_v51 = vpop.f32.mrf.mxu0  ;;  %v1228_v52 = vpop.f32.mrf.mxu1 }
 0x178   : > { %v1440_v53 = vmax.f32 %v954_v43, 0.0  ;;  %v1442_v54 = vmax.f32 %v1227_v44, 0.0  ;;  %v956_v55 = vadd.f32 %v955_v51, %v3686_v1  ;;  %v1229_v56 = vadd.f32 %v1228_v52, %v3688_v32  ;;  %2199 = vmatprep.mubr.bf16.mxu0 %v1580_v45  ;;  %1727 = vst [vmem:[%s3699_s11 + $0x300] sm:$0xff] %v1439_v49 }
 0x179   : > { %2424 = vmatprep.mubr.bf16.mxu1 %v1582_v46  ;;  %1729 = vst [vmem:[%s3699_s11 + $0x310] sm:$0xff] %v1441_v50  ;;  %v957_v57 = vpop.f32.mrf.mxu0  ;;  %v1230_v58 = vpop.f32.mrf.mxu1  ;;  %2200 = vmatmul.mubr.bf16.gmra.mxu0 %v1579_v47 }
 0x17a   : > { %2425 = vmatmul.mubr.bf16.gmra.mxu1 %v1581_v48  ;;  %1728 = vst [vmem:[%s3699_s11 + $0x308] sm:$0xff] %v1440_v53  ;;  %1730 = vst [vmem:[%s3699_s11 + $0x318] sm:$0xff] %v1442_v54  ;;  %v1443_v59 = vmax.f32 %v956_v55, 0.0  ;;  %v1445_v60 = vmax.f32 %v1229_v56, 0.0  ;;  %v958_v61 = vadd.f32 %v957_v57, %v3691_v2  ;;  %v1231_v62 = vadd.f32 %v1230_v58, %v3693_v3 }
 0x17b   : > { %v961_v63 = vpop.f32.mrf.mxu0  ;;  %v1234_v0 = vpop.f32.mrf.mxu1 }
 0x17c   : > { %1731 = vst [vmem:[%s3699_s11 + $0x320] sm:$0xff] %v1443_v59  ;;  %1733 = vst [vmem:[%s3699_s11 + $0x330] sm:$0xff] %v1445_v60  ;;  %v1444_v4 = vmax.f32 %v958_v61, 0.0  ;;  %v1446_v5 = vmax.f32 %v1231_v62, 0.0  ;;  %v962_v6 = vadd.f32 %v961_v63, %v3686_v1  ;;  %v1235_v7 = vadd.f32 %v1234_v0, %v3688_v32 }
 0x17d   : > { %v963_v8 = vpop.f32.mrf.mxu0  ;;  %v1236_v9 = vpop.f32.mrf.mxu1  ;;  %v1583_v14 = vpack.c.bf16 %v1443_v59, %v1439_v49  ;;  %v1585_v15 = vpack.c.bf16 %v1445_v60, %v1441_v50 }
 0x17e   : > { %1732 = vst [vmem:[%s3699_s11 + $0x328] sm:$0xff] %v1444_v4  ;;  %1734 = vst [vmem:[%s3699_s11 + $0x338] sm:$0xff] %v1446_v5  ;;  %v964_v10 = vadd.f32 %v963_v8, %v3691_v2  ;;  %v1237_v11 = vadd.f32 %v1236_v9, %v3693_v3  ;;  %v1584_v12 = vpack.c.bf16 %v1444_v4, %v1440_v53  ;;  %v1447_v16 = vmax.f32 %v962_v6, 0.0 }
 0x17f   : > { %v1586_v13 = vpack.c.bf16 %v1446_v5, %v1442_v54  ;;  %v1449_v17 = vmax.f32 %v1235_v7, 0.0  ;;  %v965_v18 = vpop.f32.mrf.mxu0  ;;  %v1238_v19 = vpop.f32.mrf.mxu1 }
 0x180   : > { %v1448_v20 = vmax.f32 %v964_v10, 0.0  ;;  %v1450_v21 = vmax.f32 %v1237_v11, 0.0  ;;  %v966_v22 = vadd.f32 %v965_v18, %v3686_v1  ;;  %v1239_v23 = vadd.f32 %v1238_v19, %v3688_v32  ;;  %2207 = vmatprep.mubr.bf16.mxu0 %v1584_v12  ;;  %1735 = vst [vmem:[%s3699_s11 + $0x340] sm:$0xff] %v1447_v16 }
 0x181   : > { %2432 = vmatprep.mubr.bf16.mxu1 %v1586_v13  ;;  %1737 = vst [vmem:[%s3699_s11 + $0x350] sm:$0xff] %v1449_v17  ;;  %v967_v24 = vpop.f32.mrf.mxu0  ;;  %v1240_v25 = vpop.f32.mrf.mxu1  ;;  %2208 = vmatmul.mubr.bf16.gmra.mxu0 %v1583_v14 }
 0x182   : > { %2433 = vmatmul.mubr.bf16.gmra.mxu1 %v1585_v15  ;;  %1736 = vst [vmem:[%s3699_s11 + $0x348] sm:$0xff] %v1448_v20  ;;  %1738 = vst [vmem:[%s3699_s11 + $0x358] sm:$0xff] %v1450_v21  ;;  %v1451_v26 = vmax.f32 %v966_v22, 0.0  ;;  %v1453_v27 = vmax.f32 %v1239_v23, 0.0  ;;  %v968_v28 = vadd.f32 %v967_v24, %v3691_v2  ;;  %v1241_v29 = vadd.f32 %v1240_v25, %v3693_v3 }
 0x183   : > { %v971_v30 = vpop.f32.mrf.mxu0  ;;  %v1244_v31 = vpop.f32.mrf.mxu1 }
 0x184   : > { %1739 = vst [vmem:[%s3699_s11 + $0x360] sm:$0xff] %v1451_v26  ;;  %1741 = vst [vmem:[%s3699_s11 + $0x370] sm:$0xff] %v1453_v27  ;;  %v1452_v33 = vmax.f32 %v968_v28, 0.0  ;;  %v1454_v34 = vmax.f32 %v1241_v29, 0.0  ;;  %v972_v35 = vadd.f32 %v971_v30, %v3686_v1  ;;  %v1245_v36 = vadd.f32 %v1244_v31, %v3688_v32 }
 0x185   : > { %v973_v37 = vpop.f32.mrf.mxu0  ;;  %v1246_v38 = vpop.f32.mrf.mxu1  ;;  %v1587_v43 = vpack.c.bf16 %v1451_v26, %v1447_v16  ;;  %v1589_v44 = vpack.c.bf16 %v1453_v27, %v1449_v17 }
 0x186   : > { %1740 = vst [vmem:[%s3699_s11 + $0x368] sm:$0xff] %v1452_v33  ;;  %1742 = vst [vmem:[%s3699_s11 + $0x378] sm:$0xff] %v1454_v34  ;;  %v974_v39 = vadd.f32 %v973_v37, %v3691_v2  ;;  %v1247_v40 = vadd.f32 %v1246_v38, %v3693_v3  ;;  %v1588_v41 = vpack.c.bf16 %v1452_v33, %v1448_v20  ;;  %v1455_v45 = vmax.f32 %v972_v35, 0.0 }
 0x187   : > { %v1590_v42 = vpack.c.bf16 %v1454_v34, %v1450_v21  ;;  %v1457_v46 = vmax.f32 %v1245_v36, 0.0  ;;  %v975_v47 = vpop.f32.mrf.mxu0  ;;  %v1248_v48 = vpop.f32.mrf.mxu1 }
 0x188   : > { %v1456_v49 = vmax.f32 %v974_v39, 0.0  ;;  %v1458_v50 = vmax.f32 %v1247_v40, 0.0  ;;  %v976_v51 = vadd.f32 %v975_v47, %v3686_v1  ;;  %v1249_v52 = vadd.f32 %v1248_v48, %v3688_v32  ;;  %2215 = vmatprep.mubr.bf16.mxu0 %v1588_v41  ;;  %1743 = vst [vmem:[%s3699_s11 + $0x380] sm:$0xff] %v1455_v45 }
 0x189   : > { %2440 = vmatprep.mubr.bf16.mxu1 %v1590_v42  ;;  %1745 = vst [vmem:[%s3699_s11 + $0x390] sm:$0xff] %v1457_v46  ;;  %v977_v53 = vpop.f32.mrf.mxu0  ;;  %v1250_v54 = vpop.f32.mrf.mxu1  ;;  %2216 = vmatmul.mubr.bf16.gmra.mxu0 %v1587_v43 }
 0x18a   : > { %2441 = vmatmul.mubr.bf16.gmra.mxu1 %v1589_v44  ;;  %1744 = vst [vmem:[%s3699_s11 + $0x388] sm:$0xff] %v1456_v49  ;;  %1746 = vst [vmem:[%s3699_s11 + $0x398] sm:$0xff] %v1458_v50  ;;  %v1459_v55 = vmax.f32 %v976_v51, 0.0  ;;  %v1461_v56 = vmax.f32 %v1249_v52, 0.0  ;;  %v978_v57 = vadd.f32 %v977_v53, %v3691_v2  ;;  %v1251_v58 = vadd.f32 %v1250_v54, %v3693_v3 }
 0x18b   : > { %v981_v59 = vpop.f32.mrf.mxu0  ;;  %v1254_v60 = vpop.f32.mrf.mxu1 }
 0x18c   : > { %1747 = vst [vmem:[%s3699_s11 + $0x3a0] sm:$0xff] %v1459_v55  ;;  %1749 = vst [vmem:[%s3699_s11 + $0x3b0] sm:$0xff] %v1461_v56  ;;  %v1460_v61 = vmax.f32 %v978_v57, 0.0  ;;  %v1462_v62 = vmax.f32 %v1251_v58, 0.0  ;;  %v982_v63 = vadd.f32 %v981_v59, %v3686_v1  ;;  %v1255_v0 = vadd.f32 %v1254_v60, %v3688_v32 }
 0x18d   : > { %v983_v4 = vpop.f32.mrf.mxu0  ;;  %v1256_v5 = vpop.f32.mrf.mxu1  ;;  %v1591_v10 = vpack.c.bf16 %v1459_v55, %v1455_v45  ;;  %v1593_v11 = vpack.c.bf16 %v1461_v56, %v1457_v46 }
 0x18e   : > { %1748 = vst [vmem:[%s3699_s11 + $0x3a8] sm:$0xff] %v1460_v61  ;;  %1750 = vst [vmem:[%s3699_s11 + $0x3b8] sm:$0xff] %v1462_v62  ;;  %v984_v6 = vadd.f32 %v983_v4, %v3691_v2  ;;  %v1257_v7 = vadd.f32 %v1256_v5, %v3693_v3  ;;  %v1592_v8 = vpack.c.bf16 %v1460_v61, %v1456_v49  ;;  %v1463_v12 = vmax.f32 %v982_v63, 0.0 }
 0x18f   : > { %v1594_v9 = vpack.c.bf16 %v1462_v62, %v1458_v50  ;;  %v1465_v13 = vmax.f32 %v1255_v0, 0.0  ;;  %v985_v14 = vpop.f32.mrf.mxu0  ;;  %v1258_v15 = vpop.f32.mrf.mxu1 }
 0x190   : > { %v1464_v16 = vmax.f32 %v984_v6, 0.0  ;;  %v1466_v17 = vmax.f32 %v1257_v7, 0.0  ;;  %v986_v18 = vadd.f32 %v985_v14, %v3686_v1  ;;  %v1259_v19 = vadd.f32 %v1258_v15, %v3688_v32  ;;  %2223 = vmatprep.mubr.bf16.mxu0 %v1592_v8  ;;  %1751 = vst [vmem:[%s3699_s11 + $0x3c0] sm:$0xff] %v1463_v12 }
 0x191   : > { %2448 = vmatprep.mubr.bf16.mxu1 %v1594_v9  ;;  %1753 = vst [vmem:[%s3699_s11 + $0x3d0] sm:$0xff] %v1465_v13  ;;  %v987_v20 = vpop.f32.mrf.mxu0  ;;  %v1260_v21 = vpop.f32.mrf.mxu1  ;;  %2224 = vmatmul.mubr.bf16.gmra.mxu0 %v1591_v10 }
 0x192   : > { %2449 = vmatmul.mubr.bf16.gmra.mxu1 %v1593_v11  ;;  %1752 = vst [vmem:[%s3699_s11 + $0x3c8] sm:$0xff] %v1464_v16  ;;  %1754 = vst [vmem:[%s3699_s11 + $0x3d8] sm:$0xff] %v1466_v17  ;;  %v1467_v22 = vmax.f32 %v986_v18, 0.0  ;;  %v1469_v23 = vmax.f32 %v1259_v19, 0.0  ;;  %v988_v24 = vadd.f32 %v987_v20, %v3691_v2  ;;  %v1261_v25 = vadd.f32 %v1260_v21, %v3693_v3 }
 0x193   : > { %v991_v26 = vpop.f32.mrf.mxu0  ;;  %v1264_v27 = vpop.f32.mrf.mxu1 }
 0x194   : > { %1755 = vst [vmem:[%s3699_s11 + $0x3e0] sm:$0xff] %v1467_v22  ;;  %1757 = vst [vmem:[%s3699_s11 + $0x3f0] sm:$0xff] %v1469_v23  ;;  %v1468_v28 = vmax.f32 %v988_v24, 0.0  ;;  %v1470_v29 = vmax.f32 %v1261_v25, 0.0  ;;  %v992_v30 = vadd.f32 %v991_v26, %v3686_v1  ;;  %v1265_v31 = vadd.f32 %v1264_v27, %v3688_v32 }
 0x195   : > { %v993_v33 = vpop.f32.mrf.mxu0  ;;  %v1266_v34 = vpop.f32.mrf.mxu1  ;;  %v1595_v39 = vpack.c.bf16 %v1467_v22, %v1463_v12  ;;  %v1597_v40 = vpack.c.bf16 %v1469_v23, %v1465_v13 }
 0x196   : > { %1756 = vst [vmem:[%s3699_s11 + $0x3e8] sm:$0xff] %v1468_v28  ;;  %1758 = vst [vmem:[%s3699_s11 + $0x3f8] sm:$0xff] %v1470_v29  ;;  %v994_v35 = vadd.f32 %v993_v33, %v3691_v2  ;;  %v1267_v36 = vadd.f32 %v1266_v34, %v3693_v3  ;;  %v1596_v37 = vpack.c.bf16 %v1468_v28, %v1464_v16  ;;  %v1471_v41 = vmax.f32 %v992_v30, 0.0 }
 0x197   : > { %v1598_v38 = vpack.c.bf16 %v1470_v29, %v1466_v17  ;;  %v1473_v42 = vmax.f32 %v1265_v31, 0.0  ;;  %v995_v43 = vpop.f32.mrf.mxu0  ;;  %v1268_v44 = vpop.f32.mrf.mxu1 }
 0x198   : > { %v1472_v45 = vmax.f32 %v994_v35, 0.0  ;;  %v1474_v46 = vmax.f32 %v1267_v36, 0.0  ;;  %v996_v47 = vadd.f32 %v995_v43, %v3686_v1  ;;  %v1269_v48 = vadd.f32 %v1268_v44, %v3688_v32  ;;  %2231 = vmatprep.mubr.bf16.mxu0 %v1596_v37  ;;  %1759 = vst [vmem:[%s3699_s11 + $0x400] sm:$0xff] %v1471_v41 }
 0x199   : > { %2456 = vmatprep.mubr.bf16.mxu1 %v1598_v38  ;;  %1761 = vst [vmem:[%s3699_s11 + $0x410] sm:$0xff] %v1473_v42  ;;  %v997_v49 = vpop.f32.mrf.mxu0  ;;  %v1270_v50 = vpop.f32.mrf.mxu1  ;;  %2232 = vmatmul.mubr.bf16.gmra.mxu0 %v1595_v39 }
 0x19a   : > { %2457 = vmatmul.mubr.bf16.gmra.mxu1 %v1597_v40  ;;  %1760 = vst [vmem:[%s3699_s11 + $0x408] sm:$0xff] %v1472_v45  ;;  %1762 = vst [vmem:[%s3699_s11 + $0x418] sm:$0xff] %v1474_v46  ;;  %v1475_v51 = vmax.f32 %v996_v47, 0.0  ;;  %v1477_v52 = vmax.f32 %v1269_v48, 0.0  ;;  %v998_v53 = vadd.f32 %v997_v49, %v3691_v2  ;;  %v1271_v54 = vadd.f32 %v1270_v50, %v3693_v3 }
 0x19b   : > { %v1001_v55 = vpop.f32.mrf.mxu0  ;;  %v1274_v56 = vpop.f32.mrf.mxu1 }
 0x19c   : > { %1763 = vst [vmem:[%s3699_s11 + $0x420] sm:$0xff] %v1475_v51  ;;  %1765 = vst [vmem:[%s3699_s11 + $0x430] sm:$0xff] %v1477_v52  ;;  %v1476_v57 = vmax.f32 %v998_v53, 0.0  ;;  %v1478_v58 = vmax.f32 %v1271_v54, 0.0  ;;  %v1002_v59 = vadd.f32 %v1001_v55, %v3686_v1  ;;  %v1275_v60 = vadd.f32 %v1274_v56, %v3688_v32 }
 0x19d   : > { %v1003_v61 = vpop.f32.mrf.mxu0  ;;  %v1276_v62 = vpop.f32.mrf.mxu1  ;;  %v1599_v6 = vpack.c.bf16 %v1475_v51, %v1471_v41  ;;  %v1601_v7 = vpack.c.bf16 %v1477_v52, %v1473_v42 }
 0x19e   : > { %1764 = vst [vmem:[%s3699_s11 + $0x428] sm:$0xff] %v1476_v57  ;;  %1766 = vst [vmem:[%s3699_s11 + $0x438] sm:$0xff] %v1478_v58  ;;  %v1004_v63 = vadd.f32 %v1003_v61, %v3691_v2  ;;  %v1277_v0 = vadd.f32 %v1276_v62, %v3693_v3  ;;  %v1600_v4 = vpack.c.bf16 %v1476_v57, %v1472_v45  ;;  %v1479_v8 = vmax.f32 %v1002_v59, 0.0 }
 0x19f   : > { %v1602_v5 = vpack.c.bf16 %v1478_v58, %v1474_v46  ;;  %v1481_v9 = vmax.f32 %v1275_v60, 0.0  ;;  %v1005_v10 = vpop.f32.mrf.mxu0  ;;  %v1278_v11 = vpop.f32.mrf.mxu1 }
 0x1a0   : > { %v1480_v12 = vmax.f32 %v1004_v63, 0.0  ;;  %v1482_v13 = vmax.f32 %v1277_v0, 0.0  ;;  %v1006_v14 = vadd.f32 %v1005_v10, %v3686_v1  ;;  %v1279_v15 = vadd.f32 %v1278_v11, %v3688_v32  ;;  %2239 = vmatprep.mubr.bf16.mxu0 %v1600_v4  ;;  %1767 = vst [vmem:[%s3699_s11 + $0x440] sm:$0xff] %v1479_v8 }
 0x1a1   : > { %2464 = vmatprep.mubr.bf16.mxu1 %v1602_v5  ;;  %1769 = vst [vmem:[%s3699_s11 + $0x450] sm:$0xff] %v1481_v9  ;;  %v1007_v16 = vpop.f32.mrf.mxu0  ;;  %v1280_v17 = vpop.f32.mrf.mxu1  ;;  %2240 = vmatmul.mubr.bf16.gmra.mxu0 %v1599_v6 }
 0x1a2   : > { %2465 = vmatmul.mubr.bf16.gmra.mxu1 %v1601_v7  ;;  %1768 = vst [vmem:[%s3699_s11 + $0x448] sm:$0xff] %v1480_v12  ;;  %1770 = vst [vmem:[%s3699_s11 + $0x458] sm:$0xff] %v1482_v13  ;;  %v1483_v18 = vmax.f32 %v1006_v14, 0.0  ;;  %v1485_v19 = vmax.f32 %v1279_v15, 0.0  ;;  %v1008_v20 = vadd.f32 %v1007_v16, %v3691_v2  ;;  %v1281_v21 = vadd.f32 %v1280_v17, %v3693_v3 }
 0x1a3   : > { %v1011_v22 = vpop.f32.mrf.mxu0  ;;  %v1284_v23 = vpop.f32.mrf.mxu1 }
 0x1a4   : > { %1771 = vst [vmem:[%s3699_s11 + $0x460] sm:$0xff] %v1483_v18  ;;  %1773 = vst [vmem:[%s3699_s11 + $0x470] sm:$0xff] %v1485_v19  ;;  %v1484_v24 = vmax.f32 %v1008_v20, 0.0  ;;  %v1486_v25 = vmax.f32 %v1281_v21, 0.0  ;;  %v1012_v26 = vadd.f32 %v1011_v22, %v3686_v1  ;;  %v1285_v27 = vadd.f32 %v1284_v23, %v3688_v32 }
 0x1a5   : > { %v1013_v28 = vpop.f32.mrf.mxu0  ;;  %v1286_v29 = vpop.f32.mrf.mxu1  ;;  %v1603_v35 = vpack.c.bf16 %v1483_v18, %v1479_v8  ;;  %v1605_v36 = vpack.c.bf16 %v1485_v19, %v1481_v9 }
 0x1a6   : > { %1772 = vst [vmem:[%s3699_s11 + $0x468] sm:$0xff] %v1484_v24  ;;  %1774 = vst [vmem:[%s3699_s11 + $0x478] sm:$0xff] %v1486_v25  ;;  %v1014_v30 = vadd.f32 %v1013_v28, %v3691_v2  ;;  %v1287_v31 = vadd.f32 %v1286_v29, %v3693_v3  ;;  %v1604_v33 = vpack.c.bf16 %v1484_v24, %v1480_v12  ;;  %v1487_v37 = vmax.f32 %v1012_v26, 0.0 }
 0x1a7   : > { %v1606_v34 = vpack.c.bf16 %v1486_v25, %v1482_v13  ;;  %v1489_v38 = vmax.f32 %v1285_v27, 0.0  ;;  %v1015_v39 = vpop.f32.mrf.mxu0  ;;  %v1288_v40 = vpop.f32.mrf.mxu1 }
 0x1a8   : > { %v1488_v41 = vmax.f32 %v1014_v30, 0.0  ;;  %v1490_v42 = vmax.f32 %v1287_v31, 0.0  ;;  %v1016_v43 = vadd.f32 %v1015_v39, %v3686_v1  ;;  %v1289_v44 = vadd.f32 %v1288_v40, %v3688_v32  ;;  %2247 = vmatprep.mubr.bf16.mxu0 %v1604_v33  ;;  %1775 = vst [vmem:[%s3699_s11 + $0x480] sm:$0xff] %v1487_v37 }
 0x1a9   : > { %2472 = vmatprep.mubr.bf16.mxu1 %v1606_v34  ;;  %1777 = vst [vmem:[%s3699_s11 + $0x490] sm:$0xff] %v1489_v38  ;;  %v1017_v45 = vpop.f32.mrf.mxu0  ;;  %v1290_v46 = vpop.f32.mrf.mxu1  ;;  %2248 = vmatmul.mubr.bf16.gmra.mxu0 %v1603_v35 }
 0x1aa   : > { %2473 = vmatmul.mubr.bf16.gmra.mxu1 %v1605_v36  ;;  %1776 = vst [vmem:[%s3699_s11 + $0x488] sm:$0xff] %v1488_v41  ;;  %1778 = vst [vmem:[%s3699_s11 + $0x498] sm:$0xff] %v1490_v42  ;;  %v1491_v47 = vmax.f32 %v1016_v43, 0.0  ;;  %v1493_v48 = vmax.f32 %v1289_v44, 0.0  ;;  %v1018_v49 = vadd.f32 %v1017_v45, %v3691_v2  ;;  %v1291_v50 = vadd.f32 %v1290_v46, %v3693_v3 }
 0x1ab   : > { %v1021_v51 = vpop.f32.mrf.mxu0  ;;  %v1294_v52 = vpop.f32.mrf.mxu1 }
 0x1ac   : > { %1779 = vst [vmem:[%s3699_s11 + $0x4a0] sm:$0xff] %v1491_v47  ;;  %1781 = vst [vmem:[%s3699_s11 + $0x4b0] sm:$0xff] %v1493_v48  ;;  %v1492_v53 = vmax.f32 %v1018_v49, 0.0  ;;  %v1494_v54 = vmax.f32 %v1291_v50, 0.0  ;;  %v1022_v55 = vadd.f32 %v1021_v51, %v3686_v1  ;;  %v1295_v56 = vadd.f32 %v1294_v52, %v3688_v32 }
 0x1ad   : > { %v1023_v57 = vpop.f32.mrf.mxu0  ;;  %v1296_v58 = vpop.f32.mrf.mxu1  ;;  %v1607_v63 = vpack.c.bf16 %v1491_v47, %v1487_v37  ;;  %v1609_v0 = vpack.c.bf16 %v1493_v48, %v1489_v38 }
 0x1ae   : > { %1780 = vst [vmem:[%s3699_s11 + $0x4a8] sm:$0xff] %v1492_v53  ;;  %1782 = vst [vmem:[%s3699_s11 + $0x4b8] sm:$0xff] %v1494_v54  ;;  %v1024_v59 = vadd.f32 %v1023_v57, %v3691_v2  ;;  %v1297_v60 = vadd.f32 %v1296_v58, %v3693_v3  ;;  %v1608_v61 = vpack.c.bf16 %v1492_v53, %v1488_v41  ;;  %v1495_v4 = vmax.f32 %v1022_v55, 0.0 }
 0x1af   : > { %v1610_v62 = vpack.c.bf16 %v1494_v54, %v1490_v42  ;;  %v1497_v5 = vmax.f32 %v1295_v56, 0.0  ;;  %v1025_v6 = vpop.f32.mrf.mxu0  ;;  %v1298_v7 = vpop.f32.mrf.mxu1 }
 0x1b0   : > { %v1496_v8 = vmax.f32 %v1024_v59, 0.0  ;;  %v1498_v9 = vmax.f32 %v1297_v60, 0.0  ;;  %v1026_v10 = vadd.f32 %v1025_v6, %v3686_v1  ;;  %v1299_v11 = vadd.f32 %v1298_v7, %v3688_v32  ;;  %2255 = vmatprep.mubr.bf16.mxu0 %v1608_v61  ;;  %1783 = vst [vmem:[%s3699_s11 + $0x4c0] sm:$0xff] %v1495_v4 }
 0x1b1   : > { %2480 = vmatprep.mubr.bf16.mxu1 %v1610_v62  ;;  %1785 = vst [vmem:[%s3699_s11 + $0x4d0] sm:$0xff] %v1497_v5  ;;  %v1027_v12 = vpop.f32.mrf.mxu0  ;;  %v1300_v13 = vpop.f32.mrf.mxu1  ;;  %2256 = vmatmul.mubr.bf16.gmra.mxu0 %v1607_v63 }
 0x1b2   : > { %2481 = vmatmul.mubr.bf16.gmra.mxu1 %v1609_v0  ;;  %1784 = vst [vmem:[%s3699_s11 + $0x4c8] sm:$0xff] %v1496_v8  ;;  %1786 = vst [vmem:[%s3699_s11 + $0x4d8] sm:$0xff] %v1498_v9  ;;  %v1499_v14 = vmax.f32 %v1026_v10, 0.0  ;;  %v1501_v15 = vmax.f32 %v1299_v11, 0.0  ;;  %v1028_v16 = vadd.f32 %v1027_v12, %v3691_v2  ;;  %v1301_v17 = vadd.f32 %v1300_v13, %v3693_v3 }
 0x1b3   : > { %v1031_v18 = vpop.f32.mrf.mxu0  ;;  %v1304_v19 = vpop.f32.mrf.mxu1 }
 0x1b4   : > { %1787 = vst [vmem:[%s3699_s11 + $0x4e0] sm:$0xff] %v1499_v14  ;;  %1789 = vst [vmem:[%s3699_s11 + $0x4f0] sm:$0xff] %v1501_v15  ;;  %v1500_v20 = vmax.f32 %v1028_v16, 0.0  ;;  %v1502_v21 = vmax.f32 %v1301_v17, 0.0  ;;  %v1032_v22 = vadd.f32 %v1031_v18, %v3686_v1  ;;  %v1305_v23 = vadd.f32 %v1304_v19, %v3688_v32 }
 0x1b5   : > { %v1033_v24 = vpop.f32.mrf.mxu0  ;;  %v1306_v25 = vpop.f32.mrf.mxu1  ;;  %v1611_v30 = vpack.c.bf16 %v1499_v14, %v1495_v4  ;;  %v1613_v31 = vpack.c.bf16 %v1501_v15, %v1497_v5 }
 0x1b6   : > { %1788 = vst [vmem:[%s3699_s11 + $0x4e8] sm:$0xff] %v1500_v20  ;;  %1790 = vst [vmem:[%s3699_s11 + $0x4f8] sm:$0xff] %v1502_v21  ;;  %v1034_v26 = vadd.f32 %v1033_v24, %v3691_v2  ;;  %v1307_v27 = vadd.f32 %v1306_v25, %v3693_v3  ;;  %v1612_v28 = vpack.c.bf16 %v1500_v20, %v1496_v8  ;;  %v1503_v33 = vmax.f32 %v1032_v22, 0.0 }
 0x1b7   : > { %v1614_v29 = vpack.c.bf16 %v1502_v21, %v1498_v9  ;;  %v1505_v34 = vmax.f32 %v1305_v23, 0.0  ;;  %v1035_v35 = vpop.f32.mrf.mxu0  ;;  %v1308_v36 = vpop.f32.mrf.mxu1 }
 0x1b8   : > { %v1504_v37 = vmax.f32 %v1034_v26, 0.0  ;;  %v1506_v38 = vmax.f32 %v1307_v27, 0.0  ;;  %v1036_v39 = vadd.f32 %v1035_v35, %v3686_v1  ;;  %v1309_v40 = vadd.f32 %v1308_v36, %v3688_v32  ;;  %2263 = vmatprep.mubr.bf16.mxu0 %v1612_v28  ;;  %1791 = vst [vmem:[%s3699_s11 + $0x500] sm:$0xff] %v1503_v33 }
 0x1b9   : > { %2488 = vmatprep.mubr.bf16.mxu1 %v1614_v29  ;;  %1793 = vst [vmem:[%s3699_s11 + $0x510] sm:$0xff] %v1505_v34  ;;  %v1037_v41 = vpop.f32.mrf.mxu0  ;;  %v1310_v42 = vpop.f32.mrf.mxu1  ;;  %2264 = vmatmul.mubr.bf16.gmra.mxu0 %v1611_v30 }
 0x1ba   : > { %2489 = vmatmul.mubr.bf16.gmra.mxu1 %v1613_v31  ;;  %1792 = vst [vmem:[%s3699_s11 + $0x508] sm:$0xff] %v1504_v37  ;;  %1794 = vst [vmem:[%s3699_s11 + $0x518] sm:$0xff] %v1506_v38  ;;  %v1507_v43 = vmax.f32 %v1036_v39, 0.0  ;;  %v1509_v44 = vmax.f32 %v1309_v40, 0.0  ;;  %v1038_v45 = vadd.f32 %v1037_v41, %v3691_v2  ;;  %v1311_v46 = vadd.f32 %v1310_v42, %v3693_v3 }
 0x1bb   : > { %v1041_v47 = vpop.f32.mrf.mxu0  ;;  %v1314_v48 = vpop.f32.mrf.mxu1 }
 0x1bc   : > { %1795 = vst [vmem:[%s3699_s11 + $0x520] sm:$0xff] %v1507_v43  ;;  %1797 = vst [vmem:[%s3699_s11 + $0x530] sm:$0xff] %v1509_v44  ;;  %v1508_v49 = vmax.f32 %v1038_v45, 0.0  ;;  %v1510_v50 = vmax.f32 %v1311_v46, 0.0  ;;  %v1042_v51 = vadd.f32 %v1041_v47, %v3686_v1  ;;  %v1315_v52 = vadd.f32 %v1314_v48, %v3688_v32 }
 0x1bd   : > { %v1043_v53 = vpop.f32.mrf.mxu0  ;;  %v1316_v54 = vpop.f32.mrf.mxu1  ;;  %v1615_v59 = vpack.c.bf16 %v1507_v43, %v1503_v33  ;;  %v1617_v60 = vpack.c.bf16 %v1509_v44, %v1505_v34 }
 0x1be   : > { %v1616_v55 = vpack.c.bf16 %v1508_v49, %v1504_v37  ;;  %1796 = vst [vmem:[%s3699_s11 + $0x528] sm:$0xff] %v1508_v49  ;;  %v1618_v56 = vpack.c.bf16 %v1510_v50, %v1506_v38  ;;  %1798 = vst [vmem:[%s3699_s11 + $0x538] sm:$0xff] %v1510_v50  ;;  %v1044_v57 = vadd.f32 %v1043_v53, %v3691_v2  ;;  %v1511_v61 = vmax.f32 %v1042_v51, 0.0 }
 0x1bf   : > { %v1317_v58 = vadd.f32 %v1316_v54, %v3693_v3  ;;  %v1513_v62 = vmax.f32 %v1315_v52, 0.0  ;;  %v1045_v63 = vpop.f32.mrf.mxu0  ;;  %v1318_v0 = vpop.f32.mrf.mxu1 }
 0x1c0   : > { %v1512_v4 = vmax.f32 %v1044_v57, 0.0  ;;  %v1046_v6 = vadd.f32 %v1045_v63, %v3686_v1  ;;  %v1319_v7 = vadd.f32 %v1318_v0, %v3688_v32  ;;  %2271 = vmatprep.mubr.bf16.mxu0 %v1616_v55  ;;  %2496 = vmatprep.mubr.bf16.mxu1 %v1618_v56  ;;  %1799 = vst [vmem:[%s3699_s11 + $0x540] sm:$0xff] %v1511_v61 }
 0x1c1   : > { %v1514_v5 = vmax.f32 %v1317_v58, 0.0  ;;  %1801 = vst [vmem:[%s3699_s11 + $0x550] sm:$0xff] %v1513_v62  ;;  %v1047_v8 = vpop.f32.mrf.mxu0  ;;  %v1320_v9 = vpop.f32.mrf.mxu1  ;;  %2272 = vmatmul.mubr.bf16.gmra.mxu0 %v1615_v59 }
 0x1c2   : > { %2497 = vmatmul.mubr.bf16.gmra.mxu1 %v1617_v60  ;;  %1800 = vst [vmem:[%s3699_s11 + $0x548] sm:$0xff] %v1512_v4  ;;  %v1515_v10 = vmax.f32 %v1046_v6, 0.0  ;;  %v1517_v11 = vmax.f32 %v1319_v7, 0.0  ;;  %v1048_v12 = vadd.f32 %v1047_v8, %v3691_v2  ;;  %v1321_v13 = vadd.f32 %v1320_v9, %v3693_v3 }
 0x1c3   : > { %1802 = vst [vmem:[%s3699_s11 + $0x558] sm:$0xff] %v1514_v5  ;;  %v1051_v14 = vpop.f32.mrf.mxu0  ;;  %v1324_v15 = vpop.f32.mrf.mxu1 }
 0x1c4   : > { %1803 = vst [vmem:[%s3699_s11 + $0x560] sm:$0xff] %v1515_v10  ;;  %1805 = vst [vmem:[%s3699_s11 + $0x570] sm:$0xff] %v1517_v11  ;;  %v1516_v16 = vmax.f32 %v1048_v12, 0.0  ;;  %v1518_v17 = vmax.f32 %v1321_v13, 0.0  ;;  %v1052_v18 = vadd.f32 %v1051_v14, %v3686_v1  ;;  %v1325_v19 = vadd.f32 %v1324_v15, %v3688_v32 }
 0x1c5   : > { %v1053_v20 = vpop.f32.mrf.mxu0  ;;  %v1326_v21 = vpop.f32.mrf.mxu1  ;;  %v1619_v26 = vpack.c.bf16 %v1515_v10, %v1511_v61  ;;  %v1621_v27 = vpack.c.bf16 %v1517_v11, %v1513_v62 }
 0x1c6   : > { %v1620_v22 = vpack.c.bf16 %v1516_v16, %v1512_v4  ;;  %1804 = vst [vmem:[%s3699_s11 + $0x568] sm:$0xff] %v1516_v16  ;;  %v1622_v23 = vpack.c.bf16 %v1518_v17, %v1514_v5  ;;  %1806 = vst [vmem:[%s3699_s11 + $0x578] sm:$0xff] %v1518_v17  ;;  %v1054_v24 = vadd.f32 %v1053_v20, %v3691_v2  ;;  %v1519_v28 = vmax.f32 %v1052_v18, 0.0 }
 0x1c7   : > { %v1327_v25 = vadd.f32 %v1326_v21, %v3693_v3  ;;  %v1521_v29 = vmax.f32 %v1325_v19, 0.0  ;;  %v1055_v30 = vpop.f32.mrf.mxu0  ;;  %v1328_v31 = vpop.f32.mrf.mxu1 }
 0x1c8   : > { %v1520_v33 = vmax.f32 %v1054_v24, 0.0  ;;  %v1056_v35 = vadd.f32 %v1055_v30, %v3686_v1  ;;  %v1329_v36 = vadd.f32 %v1328_v31, %v3688_v32  ;;  %2279 = vmatprep.mubr.bf16.mxu0 %v1620_v22  ;;  %2504 = vmatprep.mubr.bf16.mxu1 %v1622_v23  ;;  %1807 = vst [vmem:[%s3699_s11 + $0x580] sm:$0xff] %v1519_v28 }
 0x1c9   : > { %v1522_v34 = vmax.f32 %v1327_v25, 0.0  ;;  %1809 = vst [vmem:[%s3699_s11 + $0x590] sm:$0xff] %v1521_v29  ;;  %v1057_v37 = vpop.f32.mrf.mxu0  ;;  %v1330_v38 = vpop.f32.mrf.mxu1  ;;  %2280 = vmatmul.mubr.bf16.gmra.mxu0 %v1619_v26 }
 0x1ca   : > { %2505 = vmatmul.mubr.bf16.gmra.mxu1 %v1621_v27  ;;  %1808 = vst [vmem:[%s3699_s11 + $0x588] sm:$0xff] %v1520_v33  ;;  %v1523_v39 = vmax.f32 %v1056_v35, 0.0  ;;  %v1525_v40 = vmax.f32 %v1329_v36, 0.0  ;;  %v1058_v41 = vadd.f32 %v1057_v37, %v3691_v2  ;;  %v1331_v42 = vadd.f32 %v1330_v38, %v3693_v3 }
 0x1cb   : > { %1810 = vst [vmem:[%s3699_s11 + $0x598] sm:$0xff] %v1522_v34  ;;  %v1061_v43 = vpop.f32.mrf.mxu0  ;;  %v1334_v44 = vpop.f32.mrf.mxu1 }
 0x1cc   : > { %1811 = vst [vmem:[%s3699_s11 + $0x5a0] sm:$0xff] %v1523_v39  ;;  %1813 = vst [vmem:[%s3699_s11 + $0x5b0] sm:$0xff] %v1525_v40  ;;  %v1524_v45 = vmax.f32 %v1058_v41, 0.0  ;;  %v1526_v46 = vmax.f32 %v1331_v42, 0.0  ;;  %v1062_v47 = vadd.f32 %v1061_v43, %v3686_v1  ;;  %v1335_v48 = vadd.f32 %v1334_v44, %v3688_v32 }
 0x1cd   : > { %v1063_v49 = vpop.f32.mrf.mxu0  ;;  %v1336_v50 = vpop.f32.mrf.mxu1  ;;  %v1623_v55 = vpack.c.bf16 %v1523_v39, %v1519_v28  ;;  %v1625_v56 = vpack.c.bf16 %v1525_v40, %v1521_v29 }
 0x1ce   : > { %v1624_v51 = vpack.c.bf16 %v1524_v45, %v1520_v33  ;;  %1812 = vst [vmem:[%s3699_s11 + $0x5a8] sm:$0xff] %v1524_v45  ;;  %v1626_v52 = vpack.c.bf16 %v1526_v46, %v1522_v34  ;;  %1814 = vst [vmem:[%s3699_s11 + $0x5b8] sm:$0xff] %v1526_v46  ;;  %v1064_v53 = vadd.f32 %v1063_v49, %v3691_v2  ;;  %v1527_v57 = vmax.f32 %v1062_v47, 0.0 }
 0x1cf   : > { %v1337_v54 = vadd.f32 %v1336_v50, %v3693_v3  ;;  %v1529_v58 = vmax.f32 %v1335_v48, 0.0  ;;  %v1065_v59 = vpop.f32.mrf.mxu0  ;;  %v1338_v60 = vpop.f32.mrf.mxu1 }
 0x1d0   : > { %v1528_v61 = vmax.f32 %v1064_v53, 0.0  ;;  %v1066_v63 = vadd.f32 %v1065_v59, %v3686_v1  ;;  %v1339_v0 = vadd.f32 %v1338_v60, %v3688_v32  ;;  %2287 = vmatprep.mubr.bf16.mxu0 %v1624_v51  ;;  %2512 = vmatprep.mubr.bf16.mxu1 %v1626_v52  ;;  %1815 = vst [vmem:[%s3699_s11 + $0x5c0] sm:$0xff] %v1527_v57 }
 0x1d1   : > { %v1530_v62 = vmax.f32 %v1337_v54, 0.0  ;;  %1817 = vst [vmem:[%s3699_s11 + $0x5d0] sm:$0xff] %v1529_v58  ;;  %v1067_v4 = vpop.f32.mrf.mxu0  ;;  %v1340_v5 = vpop.f32.mrf.mxu1  ;;  %2288 = vmatmul.mubr.bf16.gmra.mxu0 %v1623_v55 }
 0x1d2   : > { %2513 = vmatmul.mubr.bf16.gmra.mxu1 %v1625_v56  ;;  %1816 = vst [vmem:[%s3699_s11 + $0x5c8] sm:$0xff] %v1528_v61  ;;  %v1531_v6 = vmax.f32 %v1066_v63, 0.0  ;;  %v1533_v7 = vmax.f32 %v1339_v0, 0.0  ;;  %v1068_v1 = vadd.f32 %v1067_v4, %v3691_v2  ;;  %v1341_v8 = vadd.f32 %v1340_v5, %v3693_v3 }
 0x1d3   : > { %1818 = vst [vmem:[%s3699_s11 + $0x5d8] sm:$0xff] %v1530_v62 }
 0x1d4   : > { %1819 = vst [vmem:[%s3699_s11 + $0x5e0] sm:$0xff] %v1531_v6  ;;  %1821 = vst [vmem:[%s3699_s11 + $0x5f0] sm:$0xff] %v1533_v7  ;;  %v1532_v32 = vmax.f32 %v1068_v1, 0.0  ;;  %v1534_v9 = vmax.f32 %v1341_v8, 0.0  ;;  %v1627_v12 = vpack.c.bf16 %v1531_v6, %v1527_v57  ;;  %v1629_v13 = vpack.c.bf16 %v1533_v7, %v1529_v58 }
 0x1d6   : > { %v1628_v10 = vpack.c.bf16 %v1532_v32, %v1528_v61  ;;  %1820 = vst [vmem:[%s3699_s11 + $0x5e8] sm:$0xff] %v1532_v32  ;;  %v1630_v11 = vpack.c.bf16 %v1534_v9, %v1530_v62  ;;  %1822 = vst [vmem:[%s3699_s11 + $0x5f8] sm:$0xff] %v1534_v9 }
 0x1d8   : > { %2295 = vmatprep.mubr.bf16.mxu0 %v1628_v10  ;;  %2520 = vmatprep.mubr.bf16.mxu1 %v1630_v11 }
 0x1d9   : > { %2296 = vmatmul.mubr.bf16.gmra.mxu0 %v1627_v12 }
 0x1da   : > { %2521 = vmatmul.mubr.bf16.gmra.mxu1 %v1629_v13 }
 0x1e1   : > { %v2113_v14 = vpop.f32.mrf.mxu0 }
 0x1e2   : > { %v2338_v15 = vpop.f32.mrf.mxu1 }
 0x1e3   : > { %v4081_v16 = vadd.f32 %v2338_v15, %v2113_v14  ;;  %v2115_v2 = vpop.f32.mrf.mxu0 }
 0x1e4   : > { %v2340_v3 = vpop.f32.mrf.mxu1 }
 0x1e5   : > { %v2116_v17 = vpop.f32.mrf.mxu0 }
 0x1e6   : > { %v2341_v18 = vpop.f32.mrf.mxu1 }
 0x1e7   : > { %v4083_v19 = vadd.f32 %v2341_v18, %v2116_v17  ;;  %v2118_v20 = vpop.f32.mrf.mxu0 }
 0x1e8   : > { %v2343_v21 = vpop.f32.mrf.mxu1 }
 0x1e9   : > { %v2121_v22 = vpop.f32.mrf.mxu0 }
 0x1ea   : > { %v2346_v23 = vpop.f32.mrf.mxu1 }
 0x1eb   : > { %v4085_v24 = vadd.f32 %v2346_v23, %v2121_v22  ;;  %v2123_v25 = vpop.f32.mrf.mxu0 }
 0x1ec   : > { %v2348_v26 = vpop.f32.mrf.mxu1 }
 0x1ed   : > { %v2124_v27 = vpop.f32.mrf.mxu0 }
 0x1ee   : > { %v2349_v28 = vpop.f32.mrf.mxu1 }
 0x1ef   : > { %v4087_v29 = vadd.f32 %v2349_v28, %v2124_v27  ;;  %v2126_v30 = vpop.f32.mrf.mxu0 }
 0x1f0   : > { %v2351_v31 = vpop.f32.mrf.mxu1 }
 0x1f1   : > { %v2129_v33 = vpop.f32.mrf.mxu0 }
 0x1f2   : > { %v2354_v34 = vpop.f32.mrf.mxu1 }
 0x1f3   : > { %v4089_v35 = vadd.f32 %v2354_v34, %v2129_v33  ;;  %v2131_v36 = vpop.f32.mrf.mxu0 }
 0x1f4   : > { %v2356_v37 = vpop.f32.mrf.mxu1 }
 0x1f5   : > { %v2132_v38 = vpop.f32.mrf.mxu0 }
 0x1f6   : > { %v2357_v39 = vpop.f32.mrf.mxu1 }
 0x1f7   : > { %v4091_v40 = vadd.f32 %v2357_v39, %v2132_v38  ;;  %v2134_v41 = vpop.f32.mrf.mxu0 }
 0x1f8   : > { %v2359_v42 = vpop.f32.mrf.mxu1 }
 0x1f9   : > { %v2137_v43 = vpop.f32.mrf.mxu0 }
 0x1fa   : > { %v2362_v44 = vpop.f32.mrf.mxu1 }
 0x1fb   : > { %v4093_v45 = vadd.f32 %v2362_v44, %v2137_v43  ;;  %v2139_v46 = vpop.f32.mrf.mxu0 }
 0x1fc   : > { %v2364_v47 = vpop.f32.mrf.mxu1 }
 0x1fd   : > { %v2140_v48 = vpop.f32.mrf.mxu0 }
 0x1fe   : > { %v2365_v49 = vpop.f32.mrf.mxu1 }
 0x1ff   : > { %v4095_v50 = vadd.f32 %v2365_v49, %v2140_v48  ;;  %v2142_v51 = vpop.f32.mrf.mxu0 }
 0x200   : > { %v2367_v52 = vpop.f32.mrf.mxu1 }
 0x201   : > { %v2145_v53 = vpop.f32.mrf.mxu0 }
 0x202   : > { %v2370_v54 = vpop.f32.mrf.mxu1 }
 0x203   : > { %v4097_v55 = vadd.f32 %v2370_v54, %v2145_v53  ;;  %v2147_v56 = vpop.f32.mrf.mxu0 }
 0x204   : > { %v2372_v57 = vpop.f32.mrf.mxu1 }
 0x205   : > { %v2148_v58 = vpop.f32.mrf.mxu0 }
 0x206   : > { %v2373_v59 = vpop.f32.mrf.mxu1 }
 0x207   : > { %v4099_v60 = vadd.f32 %v2373_v59, %v2148_v58  ;;  %v2150_v61 = vpop.f32.mrf.mxu0 }
 0x208   : > { %v2375_v62 = vpop.f32.mrf.mxu1 }
 0x209   : > { %v2153_v63 = vpop.f32.mrf.mxu0 }
 0x20a   : > { %v2378_v0 = vpop.f32.mrf.mxu1 }
 0x20b   : > { %v4101_v4 = vadd.f32 %v2378_v0, %v2153_v63  ;;  %v2155_v5 = vpop.f32.mrf.mxu0 }
 0x20c   : > { %v2380_v6 = vpop.f32.mrf.mxu1 }
 0x20d   : > { %v2156_v7 = vpop.f32.mrf.mxu0 }
 0x20e   : > { %v2381_v1 = vpop.f32.mrf.mxu1 }
 0x20f   : > { %v4103_v8 = vadd.f32 %v2381_v1, %v2156_v7  ;;  %v2158_v32 = vpop.f32.mrf.mxu0 }
 0x210   : > { %v2383_v9 = vpop.f32.mrf.mxu1 }
 0x211   : > { %v2161_v10 = vpop.f32.mrf.mxu0 }
 0x212   : > { %v2386_v11 = vpop.f32.mrf.mxu1 }
 0x213   : > { %v4105_v12 = vadd.f32 %v2386_v11, %v2161_v10  ;;  %v2163_v13 = vpop.f32.mrf.mxu0 }
 0x214   : > { %v2388_v14 = vpop.f32.mrf.mxu1 }
 0x215   : > { %v2164_v15 = vpop.f32.mrf.mxu0 }
 0x216   : > { %v2389_v2 = vpop.f32.mrf.mxu1 }
 0x217   : > { %v4107_v3 = vadd.f32 %v2389_v2, %v2164_v15  ;;  %v2166_v17 = vpop.f32.mrf.mxu0 }
 0x218   : > { %v2391_v18 = vpop.f32.mrf.mxu1 }
 0x219   : > { %v2169_v20 = vpop.f32.mrf.mxu0 }
 0x21a   : > { %v2394_v21 = vpop.f32.mrf.mxu1 }
 0x21b   : > { %v4109_v22 = vadd.f32 %v2394_v21, %v2169_v20  ;;  %v2171_v23 = vpop.f32.mrf.mxu0 }
 0x21c   : > { %v2396_v25 = vpop.f32.mrf.mxu1 }
 0x21d   : > { %v2172_v26 = vpop.f32.mrf.mxu0 }
 0x21e   : > { %v2397_v27 = vpop.f32.mrf.mxu1 }
 0x21f   : > { %v4111_v28 = vadd.f32 %v2397_v27, %v2172_v26  ;;  %v2174_v30 = vpop.f32.mrf.mxu0 }
 0x220   : > { %v2399_v31 = vpop.f32.mrf.mxu1 }
 0x221   : > { %v2177_v33 = vpop.f32.mrf.mxu0 }
 0x222   : > { %v2402_v34 = vpop.f32.mrf.mxu1 }
 0x223   : > { %v4113_v36 = vadd.f32 %v2402_v34, %v2177_v33  ;;  %v2179_v37 = vpop.f32.mrf.mxu0 }
 0x224   : > { %v2404_v38 = vpop.f32.mrf.mxu1 }
 0x225   : > { %v2180_v39 = vpop.f32.mrf.mxu0 }
 0x226   : > { %v2405_v41 = vpop.f32.mrf.mxu1 }
 0x227   : > { %v4115_v42 = vadd.f32 %v2405_v41, %v2180_v39  ;;  %v2182_v43 = vpop.f32.mrf.mxu0 }
 0x228   : > { %v2407_v44 = vpop.f32.mrf.mxu1 }
 0x229   : > { %v2185_v46 = vpop.f32.mrf.mxu0 }
 0x22a   : > { %v2410_v47 = vpop.f32.mrf.mxu1 }
 0x22b   : > { %v4117_v48 = vadd.f32 %v2410_v47, %v2185_v46  ;;  %v2187_v49 = vpop.f32.mrf.mxu0 }
 0x22c   : > { %v2412_v51 = vpop.f32.mrf.mxu1 }
 0x22d   : > { %v2188_v52 = vpop.f32.mrf.mxu0 }
 0x22e   : > { %v2413_v53 = vpop.f32.mrf.mxu1 }
 0x22f   : > { %v4119_v54 = vadd.f32 %v2413_v53, %v2188_v52  ;;  %v2190_v56 = vpop.f32.mrf.mxu0 }
 0x230   : > { %v2415_v57 = vpop.f32.mrf.mxu1 }
 0x231   : > { %v2193_v58 = vpop.f32.mrf.mxu0 }
 0x232   : > { %v2418_v59 = vpop.f32.mrf.mxu1 }
 0x233   : > { %v4121_v61 = vadd.f32 %v2418_v59, %v2193_v58  ;;  %v2195_v62 = vpop.f32.mrf.mxu0 }
 0x234   : > { %v2420_v63 = vpop.f32.mrf.mxu1 }
 0x235   : > { %v2196_v0 = vpop.f32.mrf.mxu0 }
 0x236   : > { %v2421_v5 = vpop.f32.mrf.mxu1 }
 0x237   : > { %v4123_v6 = vadd.f32 %v2421_v5, %v2196_v0  ;;  %v2198_v7 = vpop.f32.mrf.mxu0 }
 0x238   : > { %v2423_v1 = vpop.f32.mrf.mxu1 }
 0x239   : > { %v2201_v32 = vpop.f32.mrf.mxu0 }
 0x23a   : > { %v2426_v9 = vpop.f32.mrf.mxu1 }
 0x23b   : > { %v4125_v10 = vadd.f32 %v2426_v9, %v2201_v32  ;;  %v2203_v11 = vpop.f32.mrf.mxu0 }
 0x23c   : > { %v2428_v13 = vpop.f32.mrf.mxu1 }
 0x23d   : > { %v2204_v14 = vpop.f32.mrf.mxu0 }
 0x23e   : > { %v2429_v15 = vpop.f32.mrf.mxu1 }
 0x23f   : > { %v4127_v2 = vadd.f32 %v2429_v15, %v2204_v14  ;;  %v2206_v17 = vpop.f32.mrf.mxu0 }
 0x240   : > { %v2431_v18 = vpop.f32.mrf.mxu1 }
 0x241   : > { %v2209_v20 = vpop.f32.mrf.mxu0 }
 0x242   : > { %v2434_v21 = vpop.f32.mrf.mxu1 }
 0x243   : > { %v4129_v23 = vadd.f32 %v2434_v21, %v2209_v20  ;;  %v2211_v25 = vpop.f32.mrf.mxu0 }
 0x244   : > { %v2436_v26 = vpop.f32.mrf.mxu1 }
 0x245   : > { %v2212_v27 = vpop.f32.mrf.mxu0 }
 0x246   : > { %v2437_v30 = vpop.f32.mrf.mxu1 }
 0x247   : > { %v4131_v31 = vadd.f32 %v2437_v30, %v2212_v27  ;;  %v2214_v33 = vpop.f32.mrf.mxu0 }
 0x248   : > { %v2439_v34 = vpop.f32.mrf.mxu1 }
 0x249   : > { %v2217_v37 = vpop.f32.mrf.mxu0 }
 0x24a   : > { %v2442_v38 = vpop.f32.mrf.mxu1 }
 0x24b   : > { %v4133_v39 = vadd.f32 %v2442_v38, %v2217_v37  ;;  %v2219_v41 = vpop.f32.mrf.mxu0 }
 0x24c   : > { %v2444_v43 = vpop.f32.mrf.mxu1 }
 0x24d   : > { %v2220_v44 = vpop.f32.mrf.mxu0 }
 0x24e   : > { %v2445_v46 = vpop.f32.mrf.mxu1 }
 0x24f   : > { %v4135_v47 = vadd.f32 %v2445_v46, %v2220_v44  ;;  %v2222_v49 = vpop.f32.mrf.mxu0 }
 0x250   : > { %v2447_v51 = vpop.f32.mrf.mxu1 }
 0x251   : > { %v2225_v52 = vpop.f32.mrf.mxu0 }
 0x252   : > { %v2450_v53 = vpop.f32.mrf.mxu1 }
 0x253   : > { %v4137_v56 = vadd.f32 %v2450_v53, %v2225_v52  ;;  %v2227_v57 = vpop.f32.mrf.mxu0 }
 0x254   : > { %v2452_v58 = vpop.f32.mrf.mxu1 }
 0x255   : > { %v2228_v59 = vpop.f32.mrf.mxu0 }
 0x256   : > { %v2453_v62 = vpop.f32.mrf.mxu1 }
 0x257   : > { %v4139_v63 = vadd.f32 %v2453_v62, %v2228_v59  ;;  %v2230_v0 = vpop.f32.mrf.mxu0 }
 0x258   : > { %v2455_v5 = vpop.f32.mrf.mxu1 }
 0x259   : > { %v2233_v7 = vpop.f32.mrf.mxu0 }
 0x25a   : > { %v2458_v1 = vpop.f32.mrf.mxu1 }
 0x25b   : > { %v4141_v32 = vadd.f32 %v2458_v1, %v2233_v7  ;;  %v2235_v9 = vpop.f32.mrf.mxu0 }
 0x25c   : > { %v2460_v11 = vpop.f32.mrf.mxu1 }
 0x25d   : > { %v2236_v13 = vpop.f32.mrf.mxu0 }
 0x25e   : > { %v2461_v14 = vpop.f32.mrf.mxu1 }
 0x25f   : > { %v4143_v15 = vadd.f32 %v2461_v14, %v2236_v13  ;;  %v2238_v17 = vpop.f32.mrf.mxu0 }
 0x260   : > { %v2463_v18 = vpop.f32.mrf.mxu1 }
 0x261   : > { %v2241_v20 = vpop.f32.mrf.mxu0 }
 0x262   : > { %v2466_v21 = vpop.f32.mrf.mxu1 }
 0x263   : > { %v4145_v25 = vadd.f32 %v2466_v21, %v2241_v20  ;;  %v2243_v26 = vpop.f32.mrf.mxu0 }
 0x264   : > { %v2468_v27 = vpop.f32.mrf.mxu1 }
 0x265   : > { %v2244_v30 = vpop.f32.mrf.mxu0 }
 0x266   : > { %v2469_v33 = vpop.f32.mrf.mxu1 }
 0x267   : > { %v4147_v34 = vadd.f32 %v2469_v33, %v2244_v30  ;;  %v2246_v37 = vpop.f32.mrf.mxu0 }
 0x268   : > { %v2471_v38 = vpop.f32.mrf.mxu1 }
 0x269   : > { %v2249_v41 = vpop.f32.mrf.mxu0 }
 0x26a   : > { %v2474_v43 = vpop.f32.mrf.mxu1 }
 0x26b   : > { %v4149_v44 = vadd.f32 %v2474_v43, %v2249_v41  ;;  %v2251_v46 = vpop.f32.mrf.mxu0 }
 0x26c   : > { %v2476_v49 = vpop.f32.mrf.mxu1 }
 0x26d   : > { %v2252_v51 = vpop.f32.mrf.mxu0 }
 0x26e   : > { %v2477_v52 = vpop.f32.mrf.mxu1 }
 0x26f   : > { %v4151_v53 = vadd.f32 %v2477_v52, %v2252_v51  ;;  %v2254_v57 = vpop.f32.mrf.mxu0 }
 0x270   : > { %v2479_v58 = vpop.f32.mrf.mxu1 }
 0x271   : > { %v2257_v59 = vpop.f32.mrf.mxu0 }
 0x272   : > { %v2482_v62 = vpop.f32.mrf.mxu1 }
 0x273   : > { %v4153_v0 = vadd.f32 %v2482_v62, %v2257_v59  ;;  %v2259_v5 = vpop.f32.mrf.mxu0 }
 0x274   : > { %v2484_v7 = vpop.f32.mrf.mxu1 }
 0x275   : > { %v2260_v1 = vpop.f32.mrf.mxu0 }
 0x276   : > { %v2485_v9 = vpop.f32.mrf.mxu1 }
 0x277   : > { %v4155_v11 = vadd.f32 %v2485_v9, %v2260_v1  ;;  %v2262_v13 = vpop.f32.mrf.mxu0 }
 0x278   : > { %v2487_v14 = vpop.f32.mrf.mxu1 }
 0x279   : > { %v2265_v17 = vpop.f32.mrf.mxu0 }
 0x27a   : > { %v2490_v18 = vpop.f32.mrf.mxu1 }
 0x27b   : > { %v4157_v20 = vadd.f32 %v2490_v18, %v2265_v17  ;;  %v2267_v21 = vpop.f32.mrf.mxu0 }
 0x27c   : > { %v2492_v26 = vpop.f32.mrf.mxu1 }
 0x27d   : > { %v2268_v27 = vpop.f32.mrf.mxu0 }
 0x27e   : > { %v2493_v30 = vpop.f32.mrf.mxu1 }
 0x27f   : > { %v4159_v33 = vadd.f32 %v2493_v30, %v2268_v27  ;;  %v2270_v37 = vpop.f32.mrf.mxu0 }
 0x280   : > { %v2495_v38 = vpop.f32.mrf.mxu1 }
 0x281   : > { %v2273_v41 = vpop.f32.mrf.mxu0 }
 0x282   : > { %v2498_v43 = vpop.f32.mrf.mxu1 }
 0x283   : > { %v4161_v46 = vadd.f32 %v2498_v43, %v2273_v41  ;;  %v2275_v49 = vpop.f32.mrf.mxu0 }
 0x284   : > { %v2500_v51 = vpop.f32.mrf.mxu1 }
 0x285   : > { %v2276_v52 = vpop.f32.mrf.mxu0 }
 0x286   : > { %v2501_v57 = vpop.f32.mrf.mxu1 }
 0x287   : > { %v4163_v58 = vadd.f32 %v2501_v57, %v2276_v52  ;;  %v2278_v59 = vpop.f32.mrf.mxu0 }
 0x288   : > { %v2503_v62 = vpop.f32.mrf.mxu1 }
 0x289   : > { %v2281_v5 = vpop.f32.mrf.mxu0 }
 0x28a   : > { %v2506_v7 = vpop.f32.mrf.mxu1 }
 0x28b   : > { %v4165_v1 = vadd.f32 %v2506_v7, %v2281_v5  ;;  %v2283_v9 = vpop.f32.mrf.mxu0 }
 0x28c   : > { %v2508_v13 = vpop.f32.mrf.mxu1 }
 0x28d   : > { %v2284_v14 = vpop.f32.mrf.mxu0 }
 0x28e   : > { %v2509_v17 = vpop.f32.mrf.mxu1 }
 0x28f   : > { %v4167_v18 = vadd.f32 %v2509_v17, %v2284_v14  ;;  %v2286_v21 = vpop.f32.mrf.mxu0 }
 0x290   : > { %v2511_v26 = vpop.f32.mrf.mxu1 }
 0x291   : > { %v2289_v27 = vpop.f32.mrf.mxu0 }
 0x292   : > { %v2514_v30 = vpop.f32.mrf.mxu1 }
 0x293   : > { %v4169_v37 = vadd.f32 %v2514_v30, %v2289_v27  ;;  %v2291_v38 = vpop.f32.mrf.mxu0 }
 0x294   : > { %v2516_v41 = vpop.f32.mrf.mxu1 }
 0x295   : > { %v2292_v43 = vpop.f32.mrf.mxu0 }
 0x296   : > { %v2517_v49 = vpop.f32.mrf.mxu1 }
 0x297   : > { %v4171_v51 = vadd.f32 %v2517_v49, %v2292_v43  ;;  %v2294_v52 = vpop.f32.mrf.mxu0 }
 0x298   : > { %v2519_v57 = vpop.f32.mrf.mxu1 }
 0x299   : > { %v2297_v59 = vpop.f32.mrf.mxu0 }
 0x29a   : > { %v2522_v62 = vpop.f32.mrf.mxu1 }
 0x29b   : > { %v4173_v5 = vadd.f32 %v2522_v62, %v2297_v59  ;;  %v2299_v7 = vpop.f32.mrf.mxu0 }
 0x29c   : > { %v2524_v9 = vpop.f32.mrf.mxu1  ;;  %2532 = sbr.rel (%p2991_p2) target bundleno = 697 (0x2b9), region = 63 }
 0x29d   : > { %v2300_v13 = vpop.f32.mrf.mxu0 }
 0x29e   : > { %v2525_v14 = vpop.f32.mrf.mxu1 }
 0x29f   : > { %v4175_v17 = vadd.f32 %v2525_v14, %v2300_v13  ;;  %v2302_v21 = vpop.f32.mrf.mxu0 }
 0x2a0   : > { %v2527_v26 = vpop.f32.mrf.mxu1 }
 0x2a1   : > { %2533 = vst [vmem:[#allocation5] sm:$0xff] %v4081_v16  ;;  %2534 = vst [vmem:[#allocation5 + $0x8] sm:$0xff] %v4083_v19 }
 0x2a2   : > { %2535 = vst [vmem:[#allocation5 + $0x10] sm:$0xff] %v4085_v24  ;;  %2536 = vst [vmem:[#allocation5 + $0x18] sm:$0xff] %v4087_v29 }
 0x2a3   : > { %2537 = vst [vmem:[#allocation5 + $0x20] sm:$0xff] %v4089_v35  ;;  %2538 = vst [vmem:[#allocation5 + $0x28] sm:$0xff] %v4091_v40 }
 0x2a4   : > { %2539 = vst [vmem:[#allocation5 + $0x30] sm:$0xff] %v4093_v45  ;;  %2540 = vst [vmem:[#allocation5 + $0x38] sm:$0xff] %v4095_v50 }
 0x2a5   : > { %2541 = vst [vmem:[#allocation5 + $0x40] sm:$0xff] %v4097_v55  ;;  %2542 = vst [vmem:[#allocation5 + $0x48] sm:$0xff] %v4099_v60 }
 0x2a6   : > { %2543 = vst [vmem:[#allocation5 + $0x50] sm:$0xff] %v4101_v4  ;;  %2544 = vst [vmem:[#allocation5 + $0x58] sm:$0xff] %v4103_v8 }
 0x2a7   : > { %2545 = vst [vmem:[#allocation5 + $0x60] sm:$0xff] %v4105_v12  ;;  %2546 = vst [vmem:[#allocation5 + $0x68] sm:$0xff] %v4107_v3 }
 0x2a8   : > { %2547 = vst [vmem:[#allocation5 + $0x70] sm:$0xff] %v4109_v22  ;;  %2548 = vst [vmem:[#allocation5 + $0x78] sm:$0xff] %v4111_v28 }
 0x2a9   : > { %2549 = vst [vmem:[#allocation5 + $0x80] sm:$0xff] %v4113_v36  ;;  %2550 = vst [vmem:[#allocation5 + $0x88] sm:$0xff] %v4115_v42 }
 0x2aa   : > { %2551 = vst [vmem:[#allocation5 + $0x90] sm:$0xff] %v4117_v48  ;;  %2552 = vst [vmem:[#allocation5 + $0x98] sm:$0xff] %v4119_v54 }
 0x2ab   : > { %2553 = vst [vmem:[#allocation5 + $0xa0] sm:$0xff] %v4121_v61  ;;  %2554 = vst [vmem:[#allocation5 + $0xa8] sm:$0xff] %v4123_v6 }
 0x2ac   : > { %2555 = vst [vmem:[#allocation5 + $0xb0] sm:$0xff] %v4125_v10  ;;  %2556 = vst [vmem:[#allocation5 + $0xb8] sm:$0xff] %v4127_v2 }
 0x2ad   : > { %2557 = vst [vmem:[#allocation5 + $0xc0] sm:$0xff] %v4129_v23  ;;  %2558 = vst [vmem:[#allocation5 + $0xc8] sm:$0xff] %v4131_v31 }
 0x2ae   : > { %2559 = vst [vmem:[#allocation5 + $0xd0] sm:$0xff] %v4133_v39  ;;  %2560 = vst [vmem:[#allocation5 + $0xd8] sm:$0xff] %v4135_v47 }
 0x2af   : > { %2561 = vst [vmem:[#allocation5 + $0xe0] sm:$0xff] %v4137_v56  ;;  %2562 = vst [vmem:[#allocation5 + $0xe8] sm:$0xff] %v4139_v63 }
 0x2b0   : > { %2563 = vst [vmem:[#allocation5 + $0xf0] sm:$0xff] %v4141_v32  ;;  %2564 = vst [vmem:[#allocation5 + $0xf8] sm:$0xff] %v4143_v15 }
 0x2b1   : > { %2565 = vst [vmem:[#allocation5 + $0x100] sm:$0xff] %v4145_v25  ;;  %2566 = vst [vmem:[#allocation5 + $0x108] sm:$0xff] %v4147_v34 }
 0x2b2   : > { %2567 = vst [vmem:[#allocation5 + $0x110] sm:$0xff] %v4149_v44  ;;  %2568 = vst [vmem:[#allocation5 + $0x118] sm:$0xff] %v4151_v53 }
 0x2b3   : > { %2569 = vst [vmem:[#allocation5 + $0x120] sm:$0xff] %v4153_v0  ;;  %2570 = vst [vmem:[#allocation5 + $0x128] sm:$0xff] %v4155_v11 }
 0x2b4   : > { %2571 = vst [vmem:[#allocation5 + $0x130] sm:$0xff] %v4157_v20  ;;  %2572 = vst [vmem:[#allocation5 + $0x138] sm:$0xff] %v4159_v33 }
 0x2b5   : > { %2573 = vst [vmem:[#allocation5 + $0x140] sm:$0xff] %v4161_v46  ;;  %2574 = vst [vmem:[#allocation5 + $0x148] sm:$0xff] %v4163_v58 }
 0x2b6   : > { %2575 = vst [vmem:[#allocation5 + $0x150] sm:$0xff] %v4165_v1  ;;  %2576 = vst [vmem:[#allocation5 + $0x158] sm:$0xff] %v4167_v18 }
 0x2b7   : > { %2577 = vst [vmem:[#allocation5 + $0x160] sm:$0xff] %v4169_v37  ;;  %2578 = vst [vmem:[#allocation5 + $0x168] sm:$0xff] %v4171_v51 }
 0x2b8   : > { %2579 = vst [vmem:[#allocation5 + $0x170] sm:$0xff] %v4173_v5  ;;  %2580 = vst [vmem:[#allocation5 + $0x178] sm:$0xff] %v4175_v17 }
 0x2b9 PF: > { %p2992_p4 = scmp.le.s32.totalorder %s3270_s21, 0 }
 0x2bb   : > { %2584 = sbr.rel (%p2992_p4) target bundleno = 731 (0x2db), region = 67 }
 0x2c0   : > { %v2585_v27 = vld [vmem:[#allocation5] sm:$0xff]  ;;  %v2586_v30 = vld [vmem:[#allocation5 + $0x8] sm:$0xff]  ;;  %v2587_v38 = vld [vmem:[#allocation5 + $0x10] sm:$0xff] }
 0x2c1   : > { %v2633_v41 = vadd.f32 %v2585_v27, %v4081_v16  ;;  %v2634_v43 = vadd.f32 %v2586_v30, %v4083_v19  ;;  %v2635_v49 = vadd.f32 %v2587_v38, %v4085_v24  ;;  %v2588_v52 = vld [vmem:[#allocation5 + $0x18] sm:$0xff]  ;;  %v2589_v57 = vld [vmem:[#allocation5 + $0x20] sm:$0xff]  ;;  %v2590_v59 = vld [vmem:[#allocation5 + $0x28] sm:$0xff] }
 0x2c2   : > { %v2636_v62 = vadd.f32 %v2588_v52, %v4087_v29  ;;  %v2637_v7 = vadd.f32 %v2589_v57, %v4089_v35  ;;  %v2638_v9 = vadd.f32 %v2590_v59, %v4091_v40  ;;  %v2591_v13 = vld [vmem:[#allocation5 + $0x30] sm:$0xff]  ;;  %v2592_v14 = vld [vmem:[#allocation5 + $0x38] sm:$0xff]  ;;  %v2593_v21 = vld [vmem:[#allocation5 + $0x40] sm:$0xff] }
 0x2c3   : > { %2681 = vst [vmem:[#allocation5] sm:$0xff] %v2633_v41  ;;  %2682 = vst [vmem:[#allocation5 + $0x8] sm:$0xff] %v2634_v43  ;;  %v2639_v16 = vadd.f32 %v2591_v13, %v4093_v45  ;;  %v2640_v19 = vadd.f32 %v2592_v14, %v4095_v50  ;;  %v2641_v24 = vadd.f32 %v2593_v21, %v4097_v55  ;;  %v2594_v26 = vld [vmem:[#allocation5 + $0x48] sm:$0xff]  ;;  %v2595_v27 = vld [vmem:[#allocation5 + $0x50] sm:$0xff] }
 0x2c4   : > { %2683 = vst [vmem:[#allocation5 + $0x10] sm:$0xff] %v2635_v49  ;;  %v2596_v30 = vld [vmem:[#allocation5 + $0x58] sm:$0xff]  ;;  %2684 = vst [vmem:[#allocation5 + $0x18] sm:$0xff] %v2636_v62  ;;  %v2642_v29 = vadd.f32 %v2594_v26, %v4099_v60  ;;  %v2643_v35 = vadd.f32 %v2595_v27, %v4101_v4  ;;  %v2597_v38 = vld [vmem:[#allocation5 + $0x60] sm:$0xff] }
 0x2c5   : > { %2685 = vst [vmem:[#allocation5 + $0x20] sm:$0xff] %v2637_v7  ;;  %2686 = vst [vmem:[#allocation5 + $0x28] sm:$0xff] %v2638_v9  ;;  %v2644_v40 = vadd.f32 %v2596_v30, %v4103_v8  ;;  %v2598_v41 = vld [vmem:[#allocation5 + $0x68] sm:$0xff]  ;;  %v2599_v43 = vld [vmem:[#allocation5 + $0x70] sm:$0xff]  ;;  %v2645_v45 = vadd.f32 %v2597_v38, %v4105_v12 }
 0x2c6   : > { %2687 = vst [vmem:[#allocation5 + $0x30] sm:$0xff] %v2639_v16  ;;  %2688 = vst [vmem:[#allocation5 + $0x38] sm:$0xff] %v2640_v19  ;;  %v2646_v50 = vadd.f32 %v2598_v41, %v4107_v3  ;;  %v2647_v55 = vadd.f32 %v2599_v43, %v4109_v22  ;;  %v2600_v49 = vld [vmem:[#allocation5 + $0x78] sm:$0xff]  ;;  %v2601_v52 = vld [vmem:[#allocation5 + $0x80] sm:$0xff] }
 0x2c7   : > { %2689 = vst [vmem:[#allocation5 + $0x40] sm:$0xff] %v2641_v24  ;;  %v2602_v57 = vld [vmem:[#allocation5 + $0x88] sm:$0xff]  ;;  %2690 = vst [vmem:[#allocation5 + $0x48] sm:$0xff] %v2642_v29  ;;  %v2648_v60 = vadd.f32 %v2600_v49, %v4111_v28  ;;  %v2649_v4 = vadd.f32 %v2601_v52, %v4113_v36  ;;  %v2603_v59 = vld [vmem:[#allocation5 + $0x90] sm:$0xff] }
 0x2c8   : > { %2691 = vst [vmem:[#allocation5 + $0x50] sm:$0xff] %v2643_v35  ;;  %2692 = vst [vmem:[#allocation5 + $0x58] sm:$0xff] %v2644_v40  ;;  %v2650_v8 = vadd.f32 %v2602_v57, %v4115_v42  ;;  %v2604_v62 = vld [vmem:[#allocation5 + $0x98] sm:$0xff]  ;;  %v2605_v7 = vld [vmem:[#allocation5 + $0xa0] sm:$0xff]  ;;  %v2651_v12 = vadd.f32 %v2603_v59, %v4117_v48 }
 0x2c9   : > { %2693 = vst [vmem:[#allocation5 + $0x60] sm:$0xff] %v2645_v45  ;;  %2694 = vst [vmem:[#allocation5 + $0x68] sm:$0xff] %v2646_v50  ;;  %v2652_v3 = vadd.f32 %v2604_v62, %v4119_v54  ;;  %v2653_v22 = vadd.f32 %v2605_v7, %v4121_v61  ;;  %v2606_v9 = vld [vmem:[#allocation5 + $0xa8] sm:$0xff]  ;;  %v2607_v13 = vld [vmem:[#allocation5 + $0xb0] sm:$0xff] }
 0x2ca   : > { %2695 = vst [vmem:[#allocation5 + $0x70] sm:$0xff] %v2647_v55  ;;  %v2608_v14 = vld [vmem:[#allocation5 + $0xb8] sm:$0xff]  ;;  %2696 = vst [vmem:[#allocation5 + $0x78] sm:$0xff] %v2648_v60  ;;  %v2654_v28 = vadd.f32 %v2606_v9, %v4123_v6  ;;  %v2655_v36 = vadd.f32 %v2607_v13, %v4125_v10  ;;  %v2609_v21 = vld [vmem:[#allocation5 + $0xc0] sm:$0xff] }
 0x2cb   : > { %2697 = vst [vmem:[#allocation5 + $0x80] sm:$0xff] %v2649_v4  ;;  %2698 = vst [vmem:[#allocation5 + $0x88] sm:$0xff] %v2650_v8  ;;  %v2656_v42 = vadd.f32 %v2608_v14, %v4127_v2  ;;  %v2610_v16 = vld [vmem:[#allocation5 + $0xc8] sm:$0xff]  ;;  %v2611_v19 = vld [vmem:[#allocation5 + $0xd0] sm:$0xff]  ;;  %v2657_v48 = vadd.f32 %v2609_v21, %v4129_v23 }
 0x2cc   : > { %2699 = vst [vmem:[#allocation5 + $0x90] sm:$0xff] %v2651_v12  ;;  %2700 = vst [vmem:[#allocation5 + $0x98] sm:$0xff] %v2652_v3  ;;  %v2658_v54 = vadd.f32 %v2610_v16, %v4131_v31  ;;  %v2659_v61 = vadd.f32 %v2611_v19, %v4133_v39  ;;  %v2612_v24 = vld [vmem:[#allocation5 + $0xd8] sm:$0xff]  ;;  %v2613_v26 = vld [vmem:[#allocation5 + $0xe0] sm:$0xff] }
 0x2cd   : > { %2701 = vst [vmem:[#allocation5 + $0xa0] sm:$0xff] %v2653_v22  ;;  %v2614_v27 = vld [vmem:[#allocation5 + $0xe8] sm:$0xff]  ;;  %2702 = vst [vmem:[#allocation5 + $0xa8] sm:$0xff] %v2654_v28  ;;  %v2660_v6 = vadd.f32 %v2612_v24, %v4135_v47  ;;  %v2661_v10 = vadd.f32 %v2613_v26, %v4137_v56  ;;  %v2615_v30 = vld [vmem:[#allocation5 + $0xf0] sm:$0xff] }
 0x2ce   : > { %2703 = vst [vmem:[#allocation5 + $0xb0] sm:$0xff] %v2655_v36  ;;  %2704 = vst [vmem:[#allocation5 + $0xb8] sm:$0xff] %v2656_v42  ;;  %v2662_v2 = vadd.f32 %v2614_v27, %v4139_v63  ;;  %v2616_v29 = vld [vmem:[#allocation5 + $0xf8] sm:$0xff]  ;;  %v2617_v35 = vld [vmem:[#allocation5 + $0x100] sm:$0xff]  ;;  %v2663_v23 = vadd.f32 %v2615_v30, %v4141_v32 }
 0x2cf   : > { %2705 = vst [vmem:[#allocation5 + $0xc0] sm:$0xff] %v2657_v48  ;;  %2706 = vst [vmem:[#allocation5 + $0xc8] sm:$0xff] %v2658_v54  ;;  %v2664_v31 = vadd.f32 %v2616_v29, %v4143_v15  ;;  %v2665_v39 = vadd.f32 %v2617_v35, %v4145_v25  ;;  %v2618_v40 = vld [vmem:[#allocation5 + $0x108] sm:$0xff]  ;;  %v2619_v38 = vld [vmem:[#allocation5 + $0x110] sm:$0xff] }
 0x2d0   : > { %2707 = vst [vmem:[#allocation5 + $0xd0] sm:$0xff] %v2659_v61  ;;  %v2620_v41 = vld [vmem:[#allocation5 + $0x118] sm:$0xff]  ;;  %2708 = vst [vmem:[#allocation5 + $0xd8] sm:$0xff] %v2660_v6  ;;  %v2666_v47 = vadd.f32 %v2618_v40, %v4147_v34  ;;  %v2667_v56 = vadd.f32 %v2619_v38, %v4149_v44  ;;  %v2621_v43 = vld [vmem:[#allocation5 + $0x120] sm:$0xff] }
 0x2d1   : > { %2709 = vst [vmem:[#allocation5 + $0xe0] sm:$0xff] %v2661_v10  ;;  %2710 = vst [vmem:[#allocation5 + $0xe8] sm:$0xff] %v2662_v2  ;;  %v2668_v63 = vadd.f32 %v2620_v41, %v4151_v53  ;;  %v2622_v45 = vld [vmem:[#allocation5 + $0x128] sm:$0xff]  ;;  %v2623_v50 = vld [vmem:[#allocation5 + $0x130] sm:$0xff]  ;;  %v2669_v32 = vadd.f32 %v2621_v43, %v4153_v0 }
 0x2d2   : > { %2711 = vst [vmem:[#allocation5 + $0xf0] sm:$0xff] %v2663_v23  ;;  %2712 = vst [vmem:[#allocation5 + $0xf8] sm:$0xff] %v2664_v31  ;;  %v2670_v15 = vadd.f32 %v2622_v45, %v4155_v11  ;;  %v2671_v25 = vadd.f32 %v2623_v50, %v4157_v20  ;;  %v2624_v55 = vld [vmem:[#allocation5 + $0x138] sm:$0xff]  ;;  %v2625_v49 = vld [vmem:[#allocation5 + $0x140] sm:$0xff] }
 0x2d3   : > { %2713 = vst [vmem:[#allocation5 + $0x100] sm:$0xff] %v2665_v39  ;;  %v2626_v52 = vld [vmem:[#allocation5 + $0x148] sm:$0xff]  ;;  %2714 = vst [vmem:[#allocation5 + $0x108] sm:$0xff] %v2666_v47  ;;  %v2672_v34 = vadd.f32 %v2624_v55, %v4159_v33  ;;  %v2673_v44 = vadd.f32 %v2625_v49, %v4161_v46  ;;  %v2627_v57 = vld [vmem:[#allocation5 + $0x150] sm:$0xff] }
 0x2d4   : > { %2715 = vst [vmem:[#allocation5 + $0x110] sm:$0xff] %v2667_v56  ;;  %2716 = vst [vmem:[#allocation5 + $0x118] sm:$0xff] %v2668_v63  ;;  %v2674_v53 = vadd.f32 %v2626_v52, %v4163_v58  ;;  %v2628_v60 = vld [vmem:[#allocation5 + $0x158] sm:$0xff]  ;;  %v2629_v4 = vld [vmem:[#allocation5 + $0x160] sm:$0xff]  ;;  %v2675_v0 = vadd.f32 %v2627_v57, %v4165_v1 }
 0x2d5   : > { %2717 = vst [vmem:[#allocation5 + $0x120] sm:$0xff] %v2669_v32  ;;  %2718 = vst [vmem:[#allocation5 + $0x128] sm:$0xff] %v2670_v15  ;;  %v2676_v11 = vadd.f32 %v2628_v60, %v4167_v18  ;;  %v2677_v20 = vadd.f32 %v2629_v4, %v4169_v37  ;;  %v2630_v8 = vld [vmem:[#allocation5 + $0x168] sm:$0xff]  ;;  %v2631_v59 = vld [vmem:[#allocation5 + $0x170] sm:$0xff] }
 0x2d6   : > { %2719 = vst [vmem:[#allocation5 + $0x130] sm:$0xff] %v2671_v25  ;;  %v2632_v62 = vld [vmem:[#allocation5 + $0x178] sm:$0xff]  ;;  %2720 = vst [vmem:[#allocation5 + $0x138] sm:$0xff] %v2672_v34  ;;  %v2678_v33 = vadd.f32 %v2630_v8, %v4171_v51  ;;  %v2679_v46 = vadd.f32 %v2631_v59, %v4173_v5 }
 0x2d7   : > { %2721 = vst [vmem:[#allocation5 + $0x140] sm:$0xff] %v2673_v44  ;;  %2722 = vst [vmem:[#allocation5 + $0x148] sm:$0xff] %v2674_v53  ;;  %v2680_v58 = vadd.f32 %v2632_v62, %v4175_v17 }
 0x2d8   : > { %2723 = vst [vmem:[#allocation5 + $0x150] sm:$0xff] %v2675_v0  ;;  %2724 = vst [vmem:[#allocation5 + $0x158] sm:$0xff] %v2676_v11 }
 0x2d9   : > { %2725 = vst [vmem:[#allocation5 + $0x160] sm:$0xff] %v2677_v20  ;;  %2726 = vst [vmem:[#allocation5 + $0x168] sm:$0xff] %v2678_v33 }
 0x2da   : > { %2727 = vst [vmem:[#allocation5 + $0x170] sm:$0xff] %v2679_v46  ;;  %2728 = vst [vmem:[#allocation5 + $0x178] sm:$0xff] %v2680_v58 }
 0x2db PF: > { %s3000_s12 = sshll.u32 %s3270_s21, 9  ;;  %s2746_s17 = sshll.u32 %s3699_s11, 4  ;;  %s4282_s17 = int_to_ptr.vmem [resolvable:$true] %s2746_s17 }
 0x2dc   : > { %s4279_s16 = scalar_lea.hbm %s4344_s4, %s3000_s12  ;;  %s2730_s24 = scalar_lea.sflag [#allocation4], %s3455_s15 }
 0x2dd   : > { %s3174_s25 = scalar_lea.vmem %s4282_s17, 24576  ;;  %s3281_s27 = smov [#allocation3]  }
 0x2de   : > { %p3175_p6 = scmp.ne.s32.totalorder %s4282_s17, %s3174_s25  ;;  %s3178_s8 = sshll.u32 %s3281_s27, 4  ;;  %s3179_s8 = int_to_ptr.vmem [resolvable:$false] %s3178_s8 }
 0x2df   : > { %s3180_s21 = scalar_lea.vmem %s3179_s8, 49152  ;;  %p3181_p10 = scmp.lt.s32.totalorder %s4282_s17, %s3179_s8 }
 0x2e0   : > { %p3176_p7 = pnand %p3175_p6, %p3363_p5  ;;  %p3182_p11 = scmp.lt.s32.totalorder %s3180_s21, %s3174_s25 }
 0x2e2   : > { %p3177_p8 = pneg %p3176_p7  ;;  %p3183_p12 = por %p3182_p11, %p3181_p10 }
 0x2e4   : > { %p3184_p13 = pnand %p3183_p12, %p3177_p8 }
 0x2e6   : > { %3187 = shalt.err (!%p3184_p13)
}
 0x2e7   : > { %s3188_s30 = scalar_lea.hbm %s4279_s16, 24576  ;;  %s3192_s11 = scalar_lea.hbm %s4344_s4, 98304 }
 0x2e8   : > { %p3189_p0 = scmp.ne.s32.totalorder %s4279_s16, %s3188_s30  ;;  %p3193_p4 = scmp.lt.s32.totalorder %s4279_s16, %s4344_s4 }
 0x2e9   : > { %p3194_p6 = scmp.lt.s32.totalorder %s3192_s11, %s3188_s30 }
 0x2ea   : > { %p3190_p1 = pnand %p3189_p0, %p3363_p5 }
 0x2eb   : > { %p3195_p7 = por %p3194_p6, %p3193_p4 }
 0x2ec   : > { %p3191_p2 = pneg %p3190_p1 }
 0x2ee   : > { %p3196_p8 = pnand %p3195_p7, %p3191_p2 }
 0x2f0   : > { %3199 = shalt.err (!%p3196_p8)
}
 0x2f1   : > { %s3282_s14 = smov 512   ;;  %s3283_s25 = smov 2048  }
 0x2f2   : > { %s3284_s27 = smov 32   ;;  %s3285_s8 = smov [#allocation5]  }
 0x2f3   : > { %3002 = dma.vmem_to_hbm [thread:$0]  (%p3363_p5), %s4282_s17, 24576, %s4279_s16, %s2730_s24, %s3282_s14, %s3283_s25, %s3284_s27  }
 0x2f4   : > { %s2762_s21 = sshll.u32 %s3285_s8, 4  ;;  %s2763_s21 = int_to_ptr.vmem [resolvable:$true] %s2762_s21 }
 0x2f5   : > { %s3200_s9 = scalar_lea.vmem %s2763_s21, 6144  ;;  %p3207_p13 = scmp.lt.s32.totalorder %s2763_s21, %s2763_s21 }
 0x2f6   : > { %p3201_p10 = scmp.ne.s32.totalorder %s2763_s21, %s3200_s9  ;;  %p3208_p0 = scmp.lt.s32.totalorder %s3200_s9, %s3200_s9 }
 0x2f8   : > { %p3202_p11 = pnand %p3201_p10, %p3355_p3  ;;  %p3209_p1 = por %p3208_p0, %p3207_p13 }
 0x2fa   : > { %p3203_p12 = pneg %p3202_p11 }
 0x2fc   : > { %p3210_p2 = pnand %p3209_p1, %p3203_p12 }
 0x2fe   : > { %3213 = shalt.err (!%p3210_p2)
}
 0x2ff   : > { %s3286_s30 = smov 128   ;;  %s3287_s10 = smov 8  }
 0x300   : > { %3004 = dma.vmem_to_hbm [thread:$0]  (%p3355_p3), %s2763_s21, 6144, %s4345_s5, [#allocation6], %s3286_s30, %s3286_s30, %s3287_s10  }
 0x301   : > { %3249 = dma.done.wait (%p3355_p3), [#allocation6], 6144  }
 0x302   : > { %3251 = vsyncadd (%p3355_p3), [#allocation6], 4294961152 }
 0x303 PF: > { %p3014_p5 = scmp.ge.s32.totalorder %s3278_s23, 2  ;;  %s2781_s16 = sand.u32 1, %s3258_s18  }
 0x304   : > { %s2782_s17 = scalar_lea.sflag [#allocation4], %s2781_s16 }
 0x305   : > { %p3009_p4 = pnand %p3014_p5, %p3374_p9 }
 0x307   : > { %p3010_p6 = pneg %p3009_p4 }
 0x309   : > { %3253 = dma.done.wait (%p3010_p6), %s2782_s17, 24576  }
 0x30a   : > { %3255 = vsyncadd (%p3010_p6), %s2782_s17, 4294942720  ;;  %s20_s23 = sadd.s32 1, %s3278_s23   ;;  %s4349_s18 = smov %s3262_s19 }
 0x30b   : > { %p17_p7 = scmp.ge.s32.totalorder %s20_s23, 6   ;;  %s4350_s19 = smov %s3266_s20 }
 0x30c   : > { %s4351_s20 = smov %s3372_s6  ;;  %s4352_s21 = smov %s3274_s22 }
 0x30d   : > { %s4353_s22 = smov %s4355_s26  ;;  %19 = sbr.rel (!%p17_p7) target bundleno = 5 (0x5), region = 125 }
 0x312   :  { %2787 = vsyncpa [#allocation4], 1 }
 0x313   :  { %2789 = vsyncpa [#allocation4 + $0x1], 1 }
 0x314   :  { %2790 = vsyncpa [#allocation6], 1 }

</bundles_post_ra>
